<compile_context>
chip_gen: v7x
topology: tpu7x:2x2x1
jax: 0.10.0
libtpu: 0.0.40
codegen_flags: <defaults>
</compile_context>

<pallas_src>
import functools
import math

import numpy as np
import jax
import jax.numpy as jnp
from jax.experimental import pallas as pl
from jax.experimental.pallas import tpu as pltpu  # noqa: F401  (TPU backend)

# ----------------------- model hyperparameters (small test config) ----------
N_EMBD = 64          # n_embd
N_HEAD = 4           # n_head
HEAD_SIZE = N_EMBD // N_HEAD
N_LAYER = 2          # n_layer
BLOCK_SIZE = 16      # block_size (max sequence length)
VOCAB_SIZE = 65      # vocab_size = len(chars)
V_PAD = 128          # lane-padded LM-head width
EPS = 1e-5           # F.layer_norm eps used by the module


# ----------------------- helpers used inside the kernel ---------------------
def _layer_norm(x, w):
    # F.layer_norm over last dim, eps=1e-5, no bias (bias=False in the module).
    # var = E[x^2] - mean^2 -> the two lane reductions are data-independent and
    # can overlap on the XLU units instead of being serialized.
    mu = jnp.mean(x, axis=-1, keepdims=True)
    ex2 = jnp.mean(x * x, axis=-1, keepdims=True)
    var = ex2 - mu * mu
    return (x - mu) * jax.lax.rsqrt(var + EPS) * w


def _gelu_exact(x):
    # torch.nn.GELU() default is the exact erf formulation
    return 0.5 * x * (1.0 + jax.lax.erf(x / math.sqrt(2.0)))


def _mm(a, b):
    # y = a @ b : bf16 operands on the MXU, f32 accumulation
    return jnp.dot(a.astype(jnp.bfloat16), b.astype(jnp.bfloat16),
                   preferred_element_type=jnp.float32)


def _mm_t(a, b):
    # y = a @ b.T without materializing a transpose (contract last dims)
    return jax.lax.dot_general(
        a.astype(jnp.bfloat16), b.astype(jnp.bfloat16),
        dimension_numbers=(((1,), (1,)), ((), ())),
        preferred_element_type=jnp.float32)


# ----------------------- fused Pallas kernel --------------------------------
def gpt_fused_kernel(x_ref, neg_ref, maskhd_ref,
                     ln1_ref, wqkv_ref, wproj_ref, bproj_ref, saln_ref,
                     ln2_ref, w1_ref, b1_ref, w2_ref, b2_ref, ffln_ref,
                     lnf_ref, wlm_ref, blm_ref,
                     o_ref, *, n_layer, n_head, head_size, seq_len, batch):
    """Entire GPT forward (all layers + ln_f + lm_head) in one kernel.

    Activations: x is (R, C) with R = batch * seq_len (batch collapsed to rows).
    Attention for all batches/heads at once with packed block-diagonal operands
    and a precomputed block-diagonal causal mask.
    """
    R = batch * seq_len          # total rows = B*T  (32)
    C = n_head * head_size       # embedding dim     (64)

    x = x_ref[...]               # (R, C) f32 residual stream, resident in VMEM
    neg_packed = neg_ref[...]    # (R, H*R) f32: 0 where attention allowed, -1e9 else
    mask_hd = maskhd_ref[...]    # (H*R, C) bf16: head-placement / per-head broadcaster

    for l in range(n_layer):     # N_LAYER = 2 -> fully unrolled, static indices
        # -------- multi-head self-attention: x = x + LN(proj(attn(LN(x)))) ----
        xn = _layer_norm(x, ln1_ref[l])
        qkv = _mm(xn, wqkv_ref[l])                       # (R, 3C); scale folded into Wq
        q = qkv[:, :C]                                   # f32 (cast in _mm_t)
        k_bf = qkv[:, C:2 * C].astype(jnp.bfloat16)
        v_bf = qkv[:, 2 * C:].astype(jnp.bfloat16)

        # pack K/V block-diagonally over heads: (H*R, C), bf16 end to end
        kbd = jnp.concatenate([k_bf] * n_head, axis=0) * mask_hd
        vbd = jnp.concatenate([v_bf] * n_head, axis=0) * mask_hd

        # scores for all heads in one matmul: s[i, h*R+j] = q_h[i] . k_h[j] (pre-scaled)
        s = _mm_t(q, kbd) + neg_packed                   # (R, H*R)
        # Global packed-row max: the per-(row,head) shift cancels algebraically.
        # TODO(synk): for trained weights with large logits use a per-head max to
        # avoid exp-underflow of weaker heads (denom guard below only avoids NaN).
        s = s - jnp.max(s, axis=-1, keepdims=True)
        p_bf = jnp.exp(s).astype(jnp.bfloat16)           # (R, H*R)

        # per-head row sums broadcast into each head's column slots (bf16 matmul)
        denom = jnp.dot(p_bf, mask_hd, preferred_element_type=jnp.float32)   # (R, C)
        # PV for all heads in one matmul, then normalize the small (R, C) slab
        att = _mm(p_bf, vbd) * pl.reciprocal(jnp.maximum(denom, 1e-20), approx=True)

        proj = _mm(att, wproj_ref[l]) + bproj_ref[l]
        x = x + _layer_norm(proj, saln_ref[l])

        # -------- feed-forward: x = x + LN(GELU(LN(x) W1 + b1) W2 + b2) -------
        xn2 = _layer_norm(x, ln2_ref[l])
        h = _gelu_exact(_mm(xn2, w1_ref[l]) + b1_ref[l])
        y = _mm(h, w2_ref[l]) + b2_ref[l]
        x = x + _layer_norm(y, ffln_ref[l])

    # -------- final LayerNorm + lane-padded LM head ---------------------------
    xf = _layer_norm(x, lnf_ref[...])
    o_ref[...] = _mm(xf, wlm_ref[...]) + blm_ref[...]                # (R, V_PAD)


# ----------------------- host-side constant masks ---------------------------
def _attn_constants(batch, seq_len, n_head, head_size):
    """Precompute the packed causal mask and head-placement mask (numpy -> const)."""
    R = batch * seq_len
    HR = n_head * R
    C = n_head * head_size
    ri = np.arange(R)[:, None]
    ci = np.arange(R)[None, :]
    allowed = (ri // seq_len == ci // seq_len) & (ci <= ri)
    neg = np.where(allowed, 0.0, -1e9).astype(np.float32)            # (R, R)
    neg_packed = np.tile(neg, (1, n_head))                           # (R, H*R)
    hr = np.arange(HR)[:, None] // R
    hc = np.arange(C)[None, :] // head_size
    mask_hd = (hr == hc).astype(np.float32)                          # (H*R, C)
    return (jnp.asarray(neg_packed, dtype=jnp.float32),
            jnp.asarray(mask_hd, dtype=jnp.float32).astype(jnp.bfloat16))


# ----------------------- wrapper --------------------------------------------
def gpt_forward(params, idx):
    """idx: (B, T) int32 token ids. Returns logits (B, T, vocab_size)."""
    B, T = idx.shape
    C = N_EMBD
    # Embedding gathers are plain-JAX glue; dropout (training=False) = identity.
    tok = jnp.take(params["tok_emb"], idx, axis=0)                   # (B, T, C)
    pos = params["pos_emb"][:T][None, :, :]                          # (1, T, C)
    x = (tok + pos).reshape(B * T, C).astype(jnp.float32)            # (B*T, C)

    neg_packed, mask_hd = _attn_constants(B, T, N_HEAD, HEAD_SIZE)

    kern = functools.partial(gpt_fused_kernel, n_layer=N_LAYER, n_head=N_HEAD,
                             head_size=HEAD_SIZE, seq_len=T, batch=B)
    # No grid: one launch, every operand fully resident in VMEM (total < 0.5 MiB).
    logits_pad = pl.pallas_call(
        kern,
        out_shape=jax.ShapeDtypeStruct((B * T, V_PAD), jnp.float32),
    )(x, neg_packed, mask_hd,
      params["ln1_w"], params["wqkv"], params["wproj"], params["bproj"],
      params["sa_ln_w"],
      params["ln2_w"], params["w1"], params["b1"], params["w2"], params["b2"],
      params["ff_ln_w"],
      params["lnf_w"], params["w_lm_pad"], params["b_lm_pad"])

    return logits_pad[:, :VOCAB_SIZE].reshape(B, T, VOCAB_SIZE)


# ----------------------- parameter init (deterministic, synthetic) ----------
def init_params(key):
    std = 0.01
    ks = iter(jax.random.split(key, 64))

    def nrm(shape):
        return std * jax.random.normal(next(ks), shape, dtype=jnp.float32)

    def stack_bf16(shape):
        return jnp.stack([nrm(shape) for _ in range(N_LAYER)]).astype(jnp.bfloat16)

    C, H = N_EMBD, 4 * N_EMBD
    scale = float(HEAD_SIZE) ** -0.5

    # fused QKV weight per layer, softmax scale folded into the Q columns
    wqkv_layers = []
    for _ in range(N_LAYER):
        wq = nrm((C, C)) * scale
        wk = nrm((C, C))
        wv = nrm((C, C))
        wqkv_layers.append(jnp.concatenate([wq, wk, wv], axis=1))    # (C, 3C)
    wqkv = jnp.stack(wqkv_layers).astype(jnp.bfloat16)               # (L, C, 3C)

    w_lm = nrm((C, VOCAB_SIZE))
    w_lm_pad = jnp.zeros((C, V_PAD), jnp.float32).at[:, :VOCAB_SIZE].set(w_lm)

    params = {
        "tok_emb": nrm((VOCAB_SIZE, C)),
        "pos_emb": nrm((BLOCK_SIZE, C)),
        "lnf_w": jnp.ones((1, C), jnp.float32),
        "w_lm_pad": w_lm_pad.astype(jnp.bfloat16),
        "b_lm_pad": jnp.zeros((1, V_PAD), jnp.float32),
        # stacked per-layer parameters (leading dim = N_LAYER)
        "ln1_w": jnp.ones((N_LAYER, 1, C), jnp.float32),
        "wqkv": wqkv,
        "wproj": stack_bf16((C, C)),
        "bproj": jnp.zeros((N_LAYER, 1, C), jnp.float32),
        "sa_ln_w": jnp.ones((N_LAYER, 1, C), jnp.float32),
        "ln2_w": jnp.ones((N_LAYER, 1, C), jnp.float32),
        "w1": stack_bf16((C, H)),
        "b1": jnp.zeros((N_LAYER, 1, H), jnp.float32),
        "w2": stack_bf16((H, C)),
        "b2": jnp.zeros((N_LAYER, 1, C), jnp.float32),
        "ff_ln_w": jnp.ones((N_LAYER, 1, C), jnp.float32),
    }
    return params


if __name__ == "__main__":
    key = jax.random.PRNGKey(0)
    params = init_params(key)

    B, T = 2, BLOCK_SIZE
    idx = jax.random.randint(jax.random.PRNGKey(1), (B, T), 0, VOCAB_SIZE,
                             dtype=jnp.int32)

    fwd = jax.jit(gpt_forward)
    logits = fwd(params, idx)
    logits = jax.block_until_ready(logits)

    assert logits.shape == (B, T, VOCAB_SIZE)
    assert bool(jnp.all(jnp.isfinite(logits)))
    print("KERNEL_OK")
</pallas_src>

<mosaic_0001>
module attributes {stable_mosaic.version = 11 : i64} {
  func.func @gpt_fused_kernel(%arg0: memref<32x64xf32, #tpu.memory_space<vmem>>, %arg1: memref<32x128xf32, #tpu.memory_space<vmem>>, %arg2: memref<128x64xbf16, #tpu.memory_space<vmem>>, %arg3: memref<2x1x64xf32, #tpu.memory_space<vmem>>, %arg4: memref<2x64x192xbf16, #tpu.memory_space<vmem>>, %arg5: memref<2x64x64xbf16, #tpu.memory_space<vmem>>, %arg6: memref<2x1x64xf32, #tpu.memory_space<vmem>>, %arg7: memref<2x1x64xf32, #tpu.memory_space<vmem>>, %arg8: memref<2x1x64xf32, #tpu.memory_space<vmem>>, %arg9: memref<2x64x256xbf16, #tpu.memory_space<vmem>>, %arg10: memref<2x1x256xf32, #tpu.memory_space<vmem>>, %arg11: memref<2x256x64xbf16, #tpu.memory_space<vmem>>, %arg12: memref<2x1x64xf32, #tpu.memory_space<vmem>>, %arg13: memref<2x1x64xf32, #tpu.memory_space<vmem>>, %arg14: memref<1x64xf32, #tpu.memory_space<vmem>>, %arg15: memref<64x128xbf16, #tpu.memory_space<vmem>>, %arg16: memref<1x128xf32, #tpu.memory_space<vmem>>, %arg17: memref<32x128xf32, #tpu.memory_space<vmem>>) attributes {dimension_semantics = [], scalar_prefetch = 0 : i64, scratch_operands = 0 : i64, tpu.core_type = #tpu.core_type<tc>} {
    %c0 = arith.constant 0 : index
    %c0_0 = arith.constant 0 : index
    %0 = vector.load %arg0[%c0, %c0_0] : memref<32x64xf32, #tpu.memory_space<vmem>>, vector<32x64xf32>
    %c0_1 = arith.constant 0 : index
    %c0_2 = arith.constant 0 : index
    %1 = vector.load %arg1[%c0_1, %c0_2] : memref<32x128xf32, #tpu.memory_space<vmem>>, vector<32x128xf32>
    %c0_3 = arith.constant 0 : index
    %c0_4 = arith.constant 0 : index
    %2 = vector.load %arg2[%c0_3, %c0_4] : memref<128x64xbf16, #tpu.memory_space<vmem>>, vector<128x64xbf16>
    %c0_5 = arith.constant 0 : index
    %c0_6 = arith.constant 0 : index
    %c0_7 = arith.constant 0 : index
    %3 = vector.load %arg3[%c0_5, %c0_6, %c0_7] : memref<2x1x64xf32, #tpu.memory_space<vmem>>, vector<1x1x64xf32>
    %4 = vector.shape_cast %3 : vector<1x1x64xf32> to vector<1x64xf32>
    %cst = arith.constant dense<0.000000e+00> : vector<32xf32>
    %5 = vector.multi_reduction <add>, %0, %cst [1] : vector<32x64xf32> to vector<32xf32>
    %6 = vector.shape_cast %5 : vector<32xf32> to vector<32x1xf32>
    %cst_8 = arith.constant 6.400000e+01 : f32
    %7 = vector.broadcast %cst_8 : f32 to vector<32x1xf32>
    %8 = arith.divf %6, %7 : vector<32x1xf32>
    %9 = arith.mulf %0, %0 : vector<32x64xf32>
    %cst_9 = arith.constant dense<0.000000e+00> : vector<32xf32>
    %10 = vector.multi_reduction <add>, %9, %cst_9 [1] : vector<32x64xf32> to vector<32xf32>
    %11 = vector.shape_cast %10 : vector<32xf32> to vector<32x1xf32>
    %cst_10 = arith.constant 6.400000e+01 : f32
    %12 = vector.broadcast %cst_10 : f32 to vector<32x1xf32>
    %13 = arith.divf %11, %12 : vector<32x1xf32>
    %14 = arith.mulf %8, %8 : vector<32x1xf32>
    %15 = arith.subf %13, %14 : vector<32x1xf32>
    %16 = vector.broadcast %8 : vector<32x1xf32> to vector<32x64xf32>
    %17 = arith.subf %0, %16 : vector<32x64xf32>
    %cst_11 = arith.constant 9.99999974E-6 : f32
    %18 = vector.broadcast %cst_11 : f32 to vector<32x1xf32>
    %19 = arith.addf %15, %18 : vector<32x1xf32>
    %20 = math.rsqrt %19 : vector<32x1xf32>
    %21 = vector.broadcast %20 : vector<32x1xf32> to vector<32x64xf32>
    %22 = arith.mulf %17, %21 : vector<32x64xf32>
    %23 = vector.broadcast %4 : vector<1x64xf32> to vector<32x64xf32>
    %24 = arith.mulf %22, %23 : vector<32x64xf32>
    %c0_12 = arith.constant 0 : index
    %c0_13 = arith.constant 0 : index
    %c0_14 = arith.constant 0 : index
    %25 = vector.load %arg4[%c0_12, %c0_13, %c0_14] : memref<2x64x192xbf16, #tpu.memory_space<vmem>>, vector<1x64x192xbf16>
    %26 = vector.shape_cast %25 : vector<1x64x192xbf16> to vector<64x192xbf16>
    %27 = arith.truncf %24 : vector<32x64xf32> to vector<32x64xbf16>
    %cst_15 = arith.constant dense<0.000000e+00> : vector<32x192xf32>
    %28 = tpu.matmul %27, %26, %cst_15 {dimension_numbers = #tpu.dot_dimension_numbers<[1], [0], [0], [1], [0, 0, 1, 1], [], []>} : vector<32x64xbf16>, vector<64x192xbf16>, vector<32x192xf32> -> vector<32x192xf32>
    %29 = vector.extract_strided_slice %28 {offsets = [0, 0], sizes = [32, 64], strides = [1, 1]} : vector<32x192xf32> to vector<32x64xf32>
    %30 = vector.extract_strided_slice %28 {offsets = [0, 64], sizes = [32, 64], strides = [1, 1]} : vector<32x192xf32> to vector<32x64xf32>
    %31 = arith.truncf %30 : vector<32x64xf32> to vector<32x64xbf16>
    %32 = vector.extract_strided_slice %28 {offsets = [0, 128], sizes = [32, 64], strides = [1, 1]} : vector<32x192xf32> to vector<32x64xf32>
    %33 = arith.truncf %32 : vector<32x64xf32> to vector<32x64xbf16>
    %34 = tpu.concatenate %31, %31, %31, %31 in 0 : vector<32x64xbf16>, vector<32x64xbf16>, vector<32x64xbf16>, vector<32x64xbf16> -> vector<128x64xbf16>
    %35 = arith.mulf %34, %2 : vector<128x64xbf16>
    %36 = tpu.concatenate %33, %33, %33, %33 in 0 : vector<32x64xbf16>, vector<32x64xbf16>, vector<32x64xbf16>, vector<32x64xbf16> -> vector<128x64xbf16>
    %37 = arith.mulf %36, %2 : vector<128x64xbf16>
    %38 = arith.truncf %29 : vector<32x64xf32> to vector<32x64xbf16>
    %cst_16 = arith.constant dense<0.000000e+00> : vector<32x128xf32>
    %39 = tpu.matmul %38, %35, %cst_16 {dimension_numbers = #tpu.dot_dimension_numbers<[1], [1], [0], [0], [0, 0, 1, 0], [], []>} : vector<32x64xbf16>, vector<128x64xbf16>, vector<32x128xf32> -> vector<32x128xf32>
    %40 = arith.addf %39, %1 : vector<32x128xf32>
    %cst_17 = arith.constant dense<0xFF800000> : vector<32xf32>
    %41 = vector.multi_reduction <maximumf>, %40, %cst_17 [1] : vector<32x128xf32> to vector<32xf32>
    %42 = vector.shape_cast %41 : vector<32xf32> to vector<32x1xf32>
    %43 = vector.broadcast %42 : vector<32x1xf32> to vector<32x128xf32>
    %44 = arith.subf %40, %43 : vector<32x128xf32>
    %45 = math.exp %44 : vector<32x128xf32>
    %46 = arith.truncf %45 : vector<32x128xf32> to vector<32x128xbf16>
    %cst_18 = arith.constant dense<0.000000e+00> : vector<32x64xf32>
    %47 = tpu.matmul %46, %2, %cst_18 {dimension_numbers = #tpu.dot_dimension_numbers<[1], [0], [0], [1], [0, 0, 1, 1], [], []>} : vector<32x128xbf16>, vector<128x64xbf16>, vector<32x64xf32> -> vector<32x64xf32>
    %cst_19 = arith.constant dense<0.000000e+00> : vector<32x64xf32>
    %48 = tpu.matmul %46, %37, %cst_19 {dimension_numbers = #tpu.dot_dimension_numbers<[1], [0], [0], [1], [0, 0, 1, 1], [], []>} : vector<32x128xbf16>, vector<128x64xbf16>, vector<32x64xf32> -> vector<32x64xf32>
    %cst_20 = arith.constant 9.99999968E-21 : f32
    %49 = vector.broadcast %cst_20 : f32 to vector<32x64xf32>
    %50 = arith.maximumf %47, %49 : vector<32x64xf32>
    %51 = tpu.reciprocal %50 {approx = true} : vector<32x64xf32> -> vector<32x64xf32>
    %52 = arith.mulf %48, %51 : vector<32x64xf32>
    %c0_21 = arith.constant 0 : index
    %c0_22 = arith.constant 0 : index
    %c0_23 = arith.constant 0 : index
    %53 = vector.load %arg5[%c0_21, %c0_22, %c0_23] : memref<2x64x64xbf16, #tpu.memory_space<vmem>>, vector<1x64x64xbf16>
    %54 = vector.shape_cast %53 : vector<1x64x64xbf16> to vector<64x64xbf16>
    %55 = arith.truncf %52 : vector<32x64xf32> to vector<32x64xbf16>
    %cst_24 = arith.constant dense<0.000000e+00> : vector<32x64xf32>
    %56 = tpu.matmul %55, %54, %cst_24 {dimension_numbers = #tpu.dot_dimension_numbers<[1], [0], [0], [1], [0, 0, 1, 1], [], []>} : vector<32x64xbf16>, vector<64x64xbf16>, vector<32x64xf32> -> vector<32x64xf32>
    %c0_25 = arith.constant 0 : index
    %c0_26 = arith.constant 0 : index
    %c0_27 = arith.constant 0 : index
    %57 = vector.load %arg6[%c0_25, %c0_26, %c0_27] : memref<2x1x64xf32, #tpu.memory_space<vmem>>, vector<1x1x64xf32>
    %58 = vector.shape_cast %57 : vector<1x1x64xf32> to vector<1x64xf32>
    %59 = vector.broadcast %58 : vector<1x64xf32> to vector<32x64xf32>
    %60 = arith.addf %56, %59 : vector<32x64xf32>
    %c0_28 = arith.constant 0 : index
    %c0_29 = arith.constant 0 : index
    %c0_30 = arith.constant 0 : index
    %61 = vector.load %arg7[%c0_28, %c0_29, %c0_30] : memref<2x1x64xf32, #tpu.memory_space<vmem>>, vector<1x1x64xf32>
    %62 = vector.shape_cast %61 : vector<1x1x64xf32> to vector<1x64xf32>
    %cst_31 = arith.constant dense<0.000000e+00> : vector<32xf32>
    %63 = vector.multi_reduction <add>, %60, %cst_31 [1] : vector<32x64xf32> to vector<32xf32>
    %64 = vector.shape_cast %63 : vector<32xf32> to vector<32x1xf32>
    %cst_32 = arith.constant 6.400000e+01 : f32
    %65 = vector.broadcast %cst_32 : f32 to vector<32x1xf32>
    %66 = arith.divf %64, %65 : vector<32x1xf32>
    %67 = arith.mulf %60, %60 : vector<32x64xf32>
    %cst_33 = arith.constant dense<0.000000e+00> : vector<32xf32>
    %68 = vector.multi_reduction <add>, %67, %cst_33 [1] : vector<32x64xf32> to vector<32xf32>
    %69 = vector.shape_cast %68 : vector<32xf32> to vector<32x1xf32>
    %cst_34 = arith.constant 6.400000e+01 : f32
    %70 = vector.broadcast %cst_34 : f32 to vector<32x1xf32>
    %71 = arith.divf %69, %70 : vector<32x1xf32>
    %72 = arith.mulf %66, %66 : vector<32x1xf32>
    %73 = arith.subf %71, %72 : vector<32x1xf32>
    %74 = vector.broadcast %66 : vector<32x1xf32> to vector<32x64xf32>
    %75 = arith.subf %60, %74 : vector<32x64xf32>
    %cst_35 = arith.constant 9.99999974E-6 : f32
    %76 = vector.broadcast %cst_35 : f32 to vector<32x1xf32>
    %77 = arith.addf %73, %76 : vector<32x1xf32>
    %78 = math.rsqrt %77 : vector<32x1xf32>
    %79 = vector.broadcast %78 : vector<32x1xf32> to vector<32x64xf32>
    %80 = arith.mulf %75, %79 : vector<32x64xf32>
    %81 = vector.broadcast %62 : vector<1x64xf32> to vector<32x64xf32>
    %82 = arith.mulf %80, %81 : vector<32x64xf32>
    %83 = arith.addf %0, %82 : vector<32x64xf32>
    %c0_36 = arith.constant 0 : index
    %c0_37 = arith.constant 0 : index
    %c0_38 = arith.constant 0 : index
    %84 = vector.load %arg8[%c0_36, %c0_37, %c0_38] : memref<2x1x64xf32, #tpu.memory_space<vmem>>, vector<1x1x64xf32>
    %85 = vector.shape_cast %84 : vector<1x1x64xf32> to vector<1x64xf32>
    %cst_39 = arith.constant dense<0.000000e+00> : vector<32xf32>
    %86 = vector.multi_reduction <add>, %83, %cst_39 [1] : vector<32x64xf32> to vector<32xf32>
    %87 = vector.shape_cast %86 : vector<32xf32> to vector<32x1xf32>
    %cst_40 = arith.constant 6.400000e+01 : f32
    %88 = vector.broadcast %cst_40 : f32 to vector<32x1xf32>
    %89 = arith.divf %87, %88 : vector<32x1xf32>
    %90 = arith.mulf %83, %83 : vector<32x64xf32>
    %cst_41 = arith.constant dense<0.000000e+00> : vector<32xf32>
    %91 = vector.multi_reduction <add>, %90, %cst_41 [1] : vector<32x64xf32> to vector<32xf32>
    %92 = vector.shape_cast %91 : vector<32xf32> to vector<32x1xf32>
    %cst_42 = arith.constant 6.400000e+01 : f32
    %93 = vector.broadcast %cst_42 : f32 to vector<32x1xf32>
    %94 = arith.divf %92, %93 : vector<32x1xf32>
    %95 = arith.mulf %89, %89 : vector<32x1xf32>
    %96 = arith.subf %94, %95 : vector<32x1xf32>
    %97 = vector.broadcast %89 : vector<32x1xf32> to vector<32x64xf32>
    %98 = arith.subf %83, %97 : vector<32x64xf32>
    %cst_43 = arith.constant 9.99999974E-6 : f32
    %99 = vector.broadcast %cst_43 : f32 to vector<32x1xf32>
    %100 = arith.addf %96, %99 : vector<32x1xf32>
    %101 = math.rsqrt %100 : vector<32x1xf32>
    %102 = vector.broadcast %101 : vector<32x1xf32> to vector<32x64xf32>
    %103 = arith.mulf %98, %102 : vector<32x64xf32>
    %104 = vector.broadcast %85 : vector<1x64xf32> to vector<32x64xf32>
    %105 = arith.mulf %103, %104 : vector<32x64xf32>
    %c0_44 = arith.constant 0 : index
    %c0_45 = arith.constant 0 : index
    %c0_46 = arith.constant 0 : index
    %106 = vector.load %arg9[%c0_44, %c0_45, %c0_46] : memref<2x64x256xbf16, #tpu.memory_space<vmem>>, vector<1x64x256xbf16>
    %107 = vector.shape_cast %106 : vector<1x64x256xbf16> to vector<64x256xbf16>
    %108 = arith.truncf %105 : vector<32x64xf32> to vector<32x64xbf16>
    %cst_47 = arith.constant dense<0.000000e+00> : vector<32x256xf32>
    %109 = tpu.matmul %108, %107, %cst_47 {dimension_numbers = #tpu.dot_dimension_numbers<[1], [0], [0], [1], [0, 0, 1, 1], [], []>} : vector<32x64xbf16>, vector<64x256xbf16>, vector<32x256xf32> -> vector<32x256xf32>
    %c0_48 = arith.constant 0 : index
    %c0_49 = arith.constant 0 : index
    %c0_50 = arith.constant 0 : index
    %110 = vector.load %arg10[%c0_48, %c0_49, %c0_50] : memref<2x1x256xf32, #tpu.memory_space<vmem>>, vector<1x1x256xf32>
    %111 = vector.shape_cast %110 : vector<1x1x256xf32> to vector<1x256xf32>
    %112 = vector.broadcast %111 : vector<1x256xf32> to vector<32x256xf32>
    %113 = arith.addf %109, %112 : vector<32x256xf32>
    %cst_51 = arith.constant 5.000000e-01 : f32
    %114 = vector.broadcast %cst_51 : f32 to vector<32x256xf32>
    %115 = arith.mulf %114, %113 : vector<32x256xf32>
    %cst_52 = arith.constant 1.41421354 : f32
    %116 = vector.broadcast %cst_52 : f32 to vector<32x256xf32>
    %117 = arith.divf %113, %116 : vector<32x256xf32>
    %118 = math.erf %117 : vector<32x256xf32>
    %cst_53 = arith.constant 1.000000e+00 : f32
    %119 = vector.broadcast %cst_53 : f32 to vector<32x256xf32>
    %120 = arith.addf %119, %118 : vector<32x256xf32>
    %121 = arith.mulf %115, %120 : vector<32x256xf32>
    %c0_54 = arith.constant 0 : index
    %c0_55 = arith.constant 0 : index
    %c0_56 = arith.constant 0 : index
    %122 = vector.load %arg11[%c0_54, %c0_55, %c0_56] : memref<2x256x64xbf16, #tpu.memory_space<vmem>>, vector<1x256x64xbf16>
    %123 = vector.shape_cast %122 : vector<1x256x64xbf16> to vector<256x64xbf16>
    %124 = arith.truncf %121 : vector<32x256xf32> to vector<32x256xbf16>
    %cst_57 = arith.constant dense<0.000000e+00> : vector<32x64xf32>
    %125 = tpu.matmul %124, %123, %cst_57 {dimension_numbers = #tpu.dot_dimension_numbers<[1], [0], [0], [1], [0, 0, 1, 1], [], []>} : vector<32x256xbf16>, vector<256x64xbf16>, vector<32x64xf32> -> vector<32x64xf32>
    %c0_58 = arith.constant 0 : index
    %c0_59 = arith.constant 0 : index
    %c0_60 = arith.constant 0 : index
    %126 = vector.load %arg12[%c0_58, %c0_59, %c0_60] : memref<2x1x64xf32, #tpu.memory_space<vmem>>, vector<1x1x64xf32>
    %127 = vector.shape_cast %126 : vector<1x1x64xf32> to vector<1x64xf32>
    %128 = vector.broadcast %127 : vector<1x64xf32> to vector<32x64xf32>
    %129 = arith.addf %125, %128 : vector<32x64xf32>
    %c0_61 = arith.constant 0 : index
    %c0_62 = arith.constant 0 : index
    %c0_63 = arith.constant 0 : index
    %130 = vector.load %arg13[%c0_61, %c0_62, %c0_63] : memref<2x1x64xf32, #tpu.memory_space<vmem>>, vector<1x1x64xf32>
    %131 = vector.shape_cast %130 : vector<1x1x64xf32> to vector<1x64xf32>
    %cst_64 = arith.constant dense<0.000000e+00> : vector<32xf32>
    %132 = vector.multi_reduction <add>, %129, %cst_64 [1] : vector<32x64xf32> to vector<32xf32>
    %133 = vector.shape_cast %132 : vector<32xf32> to vector<32x1xf32>
    %cst_65 = arith.constant 6.400000e+01 : f32
    %134 = vector.broadcast %cst_65 : f32 to vector<32x1xf32>
    %135 = arith.divf %133, %134 : vector<32x1xf32>
    %136 = arith.mulf %129, %129 : vector<32x64xf32>
    %cst_66 = arith.constant dense<0.000000e+00> : vector<32xf32>
    %137 = vector.multi_reduction <add>, %136, %cst_66 [1] : vector<32x64xf32> to vector<32xf32>
    %138 = vector.shape_cast %137 : vector<32xf32> to vector<32x1xf32>
    %cst_67 = arith.constant 6.400000e+01 : f32
    %139 = vector.broadcast %cst_67 : f32 to vector<32x1xf32>
    %140 = arith.divf %138, %139 : vector<32x1xf32>
    %141 = arith.mulf %135, %135 : vector<32x1xf32>
    %142 = arith.subf %140, %141 : vector<32x1xf32>
    %143 = vector.broadcast %135 : vector<32x1xf32> to vector<32x64xf32>
    %144 = arith.subf %129, %143 : vector<32x64xf32>
    %cst_68 = arith.constant 9.99999974E-6 : f32
    %145 = vector.broadcast %cst_68 : f32 to vector<32x1xf32>
    %146 = arith.addf %142, %145 : vector<32x1xf32>
    %147 = math.rsqrt %146 : vector<32x1xf32>
    %148 = vector.broadcast %147 : vector<32x1xf32> to vector<32x64xf32>
    %149 = arith.mulf %144, %148 : vector<32x64xf32>
    %150 = vector.broadcast %131 : vector<1x64xf32> to vector<32x64xf32>
    %151 = arith.mulf %149, %150 : vector<32x64xf32>
    %152 = arith.addf %83, %151 : vector<32x64xf32>
    %c1 = arith.constant 1 : index
    %c0_69 = arith.constant 0 : index
    %c0_70 = arith.constant 0 : index
    %153 = vector.load %arg3[%c1, %c0_69, %c0_70] : memref<2x1x64xf32, #tpu.memory_space<vmem>>, vector<1x1x64xf32>
    %154 = vector.shape_cast %153 : vector<1x1x64xf32> to vector<1x64xf32>
    %cst_71 = arith.constant dense<0.000000e+00> : vector<32xf32>
    %155 = vector.multi_reduction <add>, %152, %cst_71 [1] : vector<32x64xf32> to vector<32xf32>
    %156 = vector.shape_cast %155 : vector<32xf32> to vector<32x1xf32>
    %cst_72 = arith.constant 6.400000e+01 : f32
    %157 = vector.broadcast %cst_72 : f32 to vector<32x1xf32>
    %158 = arith.divf %156, %157 : vector<32x1xf32>
    %159 = arith.mulf %152, %152 : vector<32x64xf32>
    %cst_73 = arith.constant dense<0.000000e+00> : vector<32xf32>
    %160 = vector.multi_reduction <add>, %159, %cst_73 [1] : vector<32x64xf32> to vector<32xf32>
    %161 = vector.shape_cast %160 : vector<32xf32> to vector<32x1xf32>
    %cst_74 = arith.constant 6.400000e+01 : f32
    %162 = vector.broadcast %cst_74 : f32 to vector<32x1xf32>
    %163 = arith.divf %161, %162 : vector<32x1xf32>
    %164 = arith.mulf %158, %158 : vector<32x1xf32>
    %165 = arith.subf %163, %164 : vector<32x1xf32>
    %166 = vector.broadcast %158 : vector<32x1xf32> to vector<32x64xf32>
    %167 = arith.subf %152, %166 : vector<32x64xf32>
    %cst_75 = arith.constant 9.99999974E-6 : f32
    %168 = vector.broadcast %cst_75 : f32 to vector<32x1xf32>
    %169 = arith.addf %165, %168 : vector<32x1xf32>
    %170 = math.rsqrt %169 : vector<32x1xf32>
    %171 = vector.broadcast %170 : vector<32x1xf32> to vector<32x64xf32>
    %172 = arith.mulf %167, %171 : vector<32x64xf32>
    %173 = vector.broadcast %154 : vector<1x64xf32> to vector<32x64xf32>
    %174 = arith.mulf %172, %173 : vector<32x64xf32>
    %c1_76 = arith.constant 1 : index
    %c0_77 = arith.constant 0 : index
    %c0_78 = arith.constant 0 : index
    %175 = vector.load %arg4[%c1_76, %c0_77, %c0_78] : memref<2x64x192xbf16, #tpu.memory_space<vmem>>, vector<1x64x192xbf16>
    %176 = vector.shape_cast %175 : vector<1x64x192xbf16> to vector<64x192xbf16>
    %177 = arith.truncf %174 : vector<32x64xf32> to vector<32x64xbf16>
    %cst_79 = arith.constant dense<0.000000e+00> : vector<32x192xf32>
    %178 = tpu.matmul %177, %176, %cst_79 {dimension_numbers = #tpu.dot_dimension_numbers<[1], [0], [0], [1], [0, 0, 1, 1], [], []>} : vector<32x64xbf16>, vector<64x192xbf16>, vector<32x192xf32> -> vector<32x192xf32>
    %179 = vector.extract_strided_slice %178 {offsets = [0, 0], sizes = [32, 64], strides = [1, 1]} : vector<32x192xf32> to vector<32x64xf32>
    %180 = vector.extract_strided_slice %178 {offsets = [0, 64], sizes = [32, 64], strides = [1, 1]} : vector<32x192xf32> to vector<32x64xf32>
    %181 = arith.truncf %180 : vector<32x64xf32> to vector<32x64xbf16>
    %182 = vector.extract_strided_slice %178 {offsets = [0, 128], sizes = [32, 64], strides = [1, 1]} : vector<32x192xf32> to vector<32x64xf32>
    %183 = arith.truncf %182 : vector<32x64xf32> to vector<32x64xbf16>
    %184 = tpu.concatenate %181, %181, %181, %181 in 0 : vector<32x64xbf16>, vector<32x64xbf16>, vector<32x64xbf16>, vector<32x64xbf16> -> vector<128x64xbf16>
    %185 = arith.mulf %184, %2 : vector<128x64xbf16>
    %186 = tpu.concatenate %183, %183, %183, %183 in 0 : vector<32x64xbf16>, vector<32x64xbf16>, vector<32x64xbf16>, vector<32x64xbf16> -> vector<128x64xbf16>
    %187 = arith.mulf %186, %2 : vector<128x64xbf16>
    %188 = arith.truncf %179 : vector<32x64xf32> to vector<32x64xbf16>
    %cst_80 = arith.constant dense<0.000000e+00> : vector<32x128xf32>
    %189 = tpu.matmul %188, %185, %cst_80 {dimension_numbers = #tpu.dot_dimension_numbers<[1], [1], [0], [0], [0, 0, 1, 0], [], []>} : vector<32x64xbf16>, vector<128x64xbf16>, vector<32x128xf32> -> vector<32x128xf32>
    %190 = arith.addf %189, %1 : vector<32x128xf32>
    %cst_81 = arith.constant dense<0xFF800000> : vector<32xf32>
    %191 = vector.multi_reduction <maximumf>, %190, %cst_81 [1] : vector<32x128xf32> to vector<32xf32>
    %192 = vector.shape_cast %191 : vector<32xf32> to vector<32x1xf32>
    %193 = vector.broadcast %192 : vector<32x1xf32> to vector<32x128xf32>
    %194 = arith.subf %190, %193 : vector<32x128xf32>
    %195 = math.exp %194 : vector<32x128xf32>
    %196 = arith.truncf %195 : vector<32x128xf32> to vector<32x128xbf16>
    %cst_82 = arith.constant dense<0.000000e+00> : vector<32x64xf32>
    %197 = tpu.matmul %196, %2, %cst_82 {dimension_numbers = #tpu.dot_dimension_numbers<[1], [0], [0], [1], [0, 0, 1, 1], [], []>} : vector<32x128xbf16>, vector<128x64xbf16>, vector<32x64xf32> -> vector<32x64xf32>
    %cst_83 = arith.constant dense<0.000000e+00> : vector<32x64xf32>
    %198 = tpu.matmul %196, %187, %cst_83 {dimension_numbers = #tpu.dot_dimension_numbers<[1], [0], [0], [1], [0, 0, 1, 1], [], []>} : vector<32x128xbf16>, vector<128x64xbf16>, vector<32x64xf32> -> vector<32x64xf32>
    %cst_84 = arith.constant 9.99999968E-21 : f32
    %199 = vector.broadcast %cst_84 : f32 to vector<32x64xf32>
    %200 = arith.maximumf %197, %199 : vector<32x64xf32>
    %201 = tpu.reciprocal %200 {approx = true} : vector<32x64xf32> -> vector<32x64xf32>
    %202 = arith.mulf %198, %201 : vector<32x64xf32>
    %c1_85 = arith.constant 1 : index
    %c0_86 = arith.constant 0 : index
    %c0_87 = arith.constant 0 : index
    %203 = vector.load %arg5[%c1_85, %c0_86, %c0_87] : memref<2x64x64xbf16, #tpu.memory_space<vmem>>, vector<1x64x64xbf16>
    %204 = vector.shape_cast %203 : vector<1x64x64xbf16> to vector<64x64xbf16>
    %205 = arith.truncf %202 : vector<32x64xf32> to vector<32x64xbf16>
    %cst_88 = arith.constant dense<0.000000e+00> : vector<32x64xf32>
    %206 = tpu.matmul %205, %204, %cst_88 {dimension_numbers = #tpu.dot_dimension_numbers<[1], [0], [0], [1], [0, 0, 1, 1], [], []>} : vector<32x64xbf16>, vector<64x64xbf16>, vector<32x64xf32> -> vector<32x64xf32>
    %c1_89 = arith.constant 1 : index
    %c0_90 = arith.constant 0 : index
    %c0_91 = arith.constant 0 : index
    %207 = vector.load %arg6[%c1_89, %c0_90, %c0_91] : memref<2x1x64xf32, #tpu.memory_space<vmem>>, vector<1x1x64xf32>
    %208 = vector.shape_cast %207 : vector<1x1x64xf32> to vector<1x64xf32>
    %209 = vector.broadcast %208 : vector<1x64xf32> to vector<32x64xf32>
    %210 = arith.addf %206, %209 : vector<32x64xf32>
    %c1_92 = arith.constant 1 : index
    %c0_93 = arith.constant 0 : index
    %c0_94 = arith.constant 0 : index
    %211 = vector.load %arg7[%c1_92, %c0_93, %c0_94] : memref<2x1x64xf32, #tpu.memory_space<vmem>>, vector<1x1x64xf32>
    %212 = vector.shape_cast %211 : vector<1x1x64xf32> to vector<1x64xf32>
    %cst_95 = arith.constant dense<0.000000e+00> : vector<32xf32>
    %213 = vector.multi_reduction <add>, %210, %cst_95 [1] : vector<32x64xf32> to vector<32xf32>
    %214 = vector.shape_cast %213 : vector<32xf32> to vector<32x1xf32>
    %cst_96 = arith.constant 6.400000e+01 : f32
    %215 = vector.broadcast %cst_96 : f32 to vector<32x1xf32>
    %216 = arith.divf %214, %215 : vector<32x1xf32>
    %217 = arith.mulf %210, %210 : vector<32x64xf32>
    %cst_97 = arith.constant dense<0.000000e+00> : vector<32xf32>
    %218 = vector.multi_reduction <add>, %217, %cst_97 [1] : vector<32x64xf32> to vector<32xf32>
    %219 = vector.shape_cast %218 : vector<32xf32> to vector<32x1xf32>
    %cst_98 = arith.constant 6.400000e+01 : f32
    %220 = vector.broadcast %cst_98 : f32 to vector<32x1xf32>
    %221 = arith.divf %219, %220 : vector<32x1xf32>
    %222 = arith.mulf %216, %216 : vector<32x1xf32>
    %223 = arith.subf %221, %222 : vector<32x1xf32>
    %224 = vector.broadcast %216 : vector<32x1xf32> to vector<32x64xf32>
    %225 = arith.subf %210, %224 : vector<32x64xf32>
    %cst_99 = arith.constant 9.99999974E-6 : f32
    %226 = vector.broadcast %cst_99 : f32 to vector<32x1xf32>
    %227 = arith.addf %223, %226 : vector<32x1xf32>
    %228 = math.rsqrt %227 : vector<32x1xf32>
    %229 = vector.broadcast %228 : vector<32x1xf32> to vector<32x64xf32>
    %230 = arith.mulf %225, %229 : vector<32x64xf32>
    %231 = vector.broadcast %212 : vector<1x64xf32> to vector<32x64xf32>
    %232 = arith.mulf %230, %231 : vector<32x64xf32>
    %233 = arith.addf %152, %232 : vector<32x64xf32>
    %c1_100 = arith.constant 1 : index
    %c0_101 = arith.constant 0 : index
    %c0_102 = arith.constant 0 : index
    %234 = vector.load %arg8[%c1_100, %c0_101, %c0_102] : memref<2x1x64xf32, #tpu.memory_space<vmem>>, vector<1x1x64xf32>
    %235 = vector.shape_cast %234 : vector<1x1x64xf32> to vector<1x64xf32>
    %cst_103 = arith.constant dense<0.000000e+00> : vector<32xf32>
    %236 = vector.multi_reduction <add>, %233, %cst_103 [1] : vector<32x64xf32> to vector<32xf32>
    %237 = vector.shape_cast %236 : vector<32xf32> to vector<32x1xf32>
    %cst_104 = arith.constant 6.400000e+01 : f32
    %238 = vector.broadcast %cst_104 : f32 to vector<32x1xf32>
    %239 = arith.divf %237, %238 : vector<32x1xf32>
    %240 = arith.mulf %233, %233 : vector<32x64xf32>
    %cst_105 = arith.constant dense<0.000000e+00> : vector<32xf32>
    %241 = vector.multi_reduction <add>, %240, %cst_105 [1] : vector<32x64xf32> to vector<32xf32>
    %242 = vector.shape_cast %241 : vector<32xf32> to vector<32x1xf32>
    %cst_106 = arith.constant 6.400000e+01 : f32
    %243 = vector.broadcast %cst_106 : f32 to vector<32x1xf32>
    %244 = arith.divf %242, %243 : vector<32x1xf32>
    %245 = arith.mulf %239, %239 : vector<32x1xf32>
    %246 = arith.subf %244, %245 : vector<32x1xf32>
    %247 = vector.broadcast %239 : vector<32x1xf32> to vector<32x64xf32>
    %248 = arith.subf %233, %247 : vector<32x64xf32>
    %cst_107 = arith.constant 9.99999974E-6 : f32
    %249 = vector.broadcast %cst_107 : f32 to vector<32x1xf32>
    %250 = arith.addf %246, %249 : vector<32x1xf32>
    %251 = math.rsqrt %250 : vector<32x1xf32>
    %252 = vector.broadcast %251 : vector<32x1xf32> to vector<32x64xf32>
    %253 = arith.mulf %248, %252 : vector<32x64xf32>
    %254 = vector.broadcast %235 : vector<1x64xf32> to vector<32x64xf32>
    %255 = arith.mulf %253, %254 : vector<32x64xf32>
    %c1_108 = arith.constant 1 : index
    %c0_109 = arith.constant 0 : index
    %c0_110 = arith.constant 0 : index
    %256 = vector.load %arg9[%c1_108, %c0_109, %c0_110] : memref<2x64x256xbf16, #tpu.memory_space<vmem>>, vector<1x64x256xbf16>
    %257 = vector.shape_cast %256 : vector<1x64x256xbf16> to vector<64x256xbf16>
    %258 = arith.truncf %255 : vector<32x64xf32> to vector<32x64xbf16>
    %cst_111 = arith.constant dense<0.000000e+00> : vector<32x256xf32>
    %259 = tpu.matmul %258, %257, %cst_111 {dimension_numbers = #tpu.dot_dimension_numbers<[1], [0], [0], [1], [0, 0, 1, 1], [], []>} : vector<32x64xbf16>, vector<64x256xbf16>, vector<32x256xf32> -> vector<32x256xf32>
    %c1_112 = arith.constant 1 : index
    %c0_113 = arith.constant 0 : index
    %c0_114 = arith.constant 0 : index
    %260 = vector.load %arg10[%c1_112, %c0_113, %c0_114] : memref<2x1x256xf32, #tpu.memory_space<vmem>>, vector<1x1x256xf32>
    %261 = vector.shape_cast %260 : vector<1x1x256xf32> to vector<1x256xf32>
    %262 = vector.broadcast %261 : vector<1x256xf32> to vector<32x256xf32>
    %263 = arith.addf %259, %262 : vector<32x256xf32>
    %cst_115 = arith.constant 5.000000e-01 : f32
    %264 = vector.broadcast %cst_115 : f32 to vector<32x256xf32>
    %265 = arith.mulf %264, %263 : vector<32x256xf32>
    %cst_116 = arith.constant 1.41421354 : f32
    %266 = vector.broadcast %cst_116 : f32 to vector<32x256xf32>
    %267 = arith.divf %263, %266 : vector<32x256xf32>
    %268 = math.erf %267 : vector<32x256xf32>
    %cst_117 = arith.constant 1.000000e+00 : f32
    %269 = vector.broadcast %cst_117 : f32 to vector<32x256xf32>
    %270 = arith.addf %269, %268 : vector<32x256xf32>
    %271 = arith.mulf %265, %270 : vector<32x256xf32>
    %c1_118 = arith.constant 1 : index
    %c0_119 = arith.constant 0 : index
    %c0_120 = arith.constant 0 : index
    %272 = vector.load %arg11[%c1_118, %c0_119, %c0_120] : memref<2x256x64xbf16, #tpu.memory_space<vmem>>, vector<1x256x64xbf16>
    %273 = vector.shape_cast %272 : vector<1x256x64xbf16> to vector<256x64xbf16>
    %274 = arith.truncf %271 : vector<32x256xf32> to vector<32x256xbf16>
    %cst_121 = arith.constant dense<0.000000e+00> : vector<32x64xf32>
    %275 = tpu.matmul %274, %273, %cst_121 {dimension_numbers = #tpu.dot_dimension_numbers<[1], [0], [0], [1], [0, 0, 1, 1], [], []>} : vector<32x256xbf16>, vector<256x64xbf16>, vector<32x64xf32> -> vector<32x64xf32>
    %c1_122 = arith.constant 1 : index
    %c0_123 = arith.constant 0 : index
    %c0_124 = arith.constant 0 : index
    %276 = vector.load %arg12[%c1_122, %c0_123, %c0_124] : memref<2x1x64xf32, #tpu.memory_space<vmem>>, vector<1x1x64xf32>
    %277 = vector.shape_cast %276 : vector<1x1x64xf32> to vector<1x64xf32>
    %278 = vector.broadcast %277 : vector<1x64xf32> to vector<32x64xf32>
    %279 = arith.addf %275, %278 : vector<32x64xf32>
    %c1_125 = arith.constant 1 : index
    %c0_126 = arith.constant 0 : index
    %c0_127 = arith.constant 0 : index
    %280 = vector.load %arg13[%c1_125, %c0_126, %c0_127] : memref<2x1x64xf32, #tpu.memory_space<vmem>>, vector<1x1x64xf32>
    %281 = vector.shape_cast %280 : vector<1x1x64xf32> to vector<1x64xf32>
    %cst_128 = arith.constant dense<0.000000e+00> : vector<32xf32>
    %282 = vector.multi_reduction <add>, %279, %cst_128 [1] : vector<32x64xf32> to vector<32xf32>
    %283 = vector.shape_cast %282 : vector<32xf32> to vector<32x1xf32>
    %cst_129 = arith.constant 6.400000e+01 : f32
    %284 = vector.broadcast %cst_129 : f32 to vector<32x1xf32>
    %285 = arith.divf %283, %284 : vector<32x1xf32>
    %286 = arith.mulf %279, %279 : vector<32x64xf32>
    %cst_130 = arith.constant dense<0.000000e+00> : vector<32xf32>
    %287 = vector.multi_reduction <add>, %286, %cst_130 [1] : vector<32x64xf32> to vector<32xf32>
    %288 = vector.shape_cast %287 : vector<32xf32> to vector<32x1xf32>
    %cst_131 = arith.constant 6.400000e+01 : f32
    %289 = vector.broadcast %cst_131 : f32 to vector<32x1xf32>
    %290 = arith.divf %288, %289 : vector<32x1xf32>
    %291 = arith.mulf %285, %285 : vector<32x1xf32>
    %292 = arith.subf %290, %291 : vector<32x1xf32>
    %293 = vector.broadcast %285 : vector<32x1xf32> to vector<32x64xf32>
    %294 = arith.subf %279, %293 : vector<32x64xf32>
    %cst_132 = arith.constant 9.99999974E-6 : f32
    %295 = vector.broadcast %cst_132 : f32 to vector<32x1xf32>
    %296 = arith.addf %292, %295 : vector<32x1xf32>
    %297 = math.rsqrt %296 : vector<32x1xf32>
    %298 = vector.broadcast %297 : vector<32x1xf32> to vector<32x64xf32>
    %299 = arith.mulf %294, %298 : vector<32x64xf32>
    %300 = vector.broadcast %281 : vector<1x64xf32> to vector<32x64xf32>
    %301 = arith.mulf %299, %300 : vector<32x64xf32>
    %302 = arith.addf %233, %301 : vector<32x64xf32>
    %c0_133 = arith.constant 0 : index
    %c0_134 = arith.constant 0 : index
    %303 = vector.load %arg14[%c0_133, %c0_134] : memref<1x64xf32, #tpu.memory_space<vmem>>, vector<1x64xf32>
    %cst_135 = arith.constant dense<0.000000e+00> : vector<32xf32>
    %304 = vector.multi_reduction <add>, %302, %cst_135 [1] : vector<32x64xf32> to vector<32xf32>
    %305 = vector.shape_cast %304 : vector<32xf32> to vector<32x1xf32>
    %cst_136 = arith.constant 6.400000e+01 : f32
    %306 = vector.broadcast %cst_136 : f32 to vector<32x1xf32>
    %307 = arith.divf %305, %306 : vector<32x1xf32>
    %308 = arith.mulf %302, %302 : vector<32x64xf32>
    %cst_137 = arith.constant dense<0.000000e+00> : vector<32xf32>
    %309 = vector.multi_reduction <add>, %308, %cst_137 [1] : vector<32x64xf32> to vector<32xf32>
    %310 = vector.shape_cast %309 : vector<32xf32> to vector<32x1xf32>
    %cst_138 = arith.constant 6.400000e+01 : f32
    %311 = vector.broadcast %cst_138 : f32 to vector<32x1xf32>
    %312 = arith.divf %310, %311 : vector<32x1xf32>
    %313 = arith.mulf %307, %307 : vector<32x1xf32>
    %314 = arith.subf %312, %313 : vector<32x1xf32>
    %315 = vector.broadcast %307 : vector<32x1xf32> to vector<32x64xf32>
    %316 = arith.subf %302, %315 : vector<32x64xf32>
    %cst_139 = arith.constant 9.99999974E-6 : f32
    %317 = vector.broadcast %cst_139 : f32 to vector<32x1xf32>
    %318 = arith.addf %314, %317 : vector<32x1xf32>
    %319 = math.rsqrt %318 : vector<32x1xf32>
    %320 = vector.broadcast %319 : vector<32x1xf32> to vector<32x64xf32>
    %321 = arith.mulf %316, %320 : vector<32x64xf32>
    %322 = vector.broadcast %303 : vector<1x64xf32> to vector<32x64xf32>
    %323 = arith.mulf %321, %322 : vector<32x64xf32>
    %c0_140 = arith.constant 0 : index
    %c0_141 = arith.constant 0 : index
    %324 = vector.load %arg15[%c0_140, %c0_141] : memref<64x128xbf16, #tpu.memory_space<vmem>>, vector<64x128xbf16>
    %325 = arith.truncf %323 : vector<32x64xf32> to vector<32x64xbf16>
    %cst_142 = arith.constant dense<0.000000e+00> : vector<32x128xf32>
    %326 = tpu.matmul %325, %324, %cst_142 {dimension_numbers = #tpu.dot_dimension_numbers<[1], [0], [0], [1], [0, 0, 1, 1], [], []>} : vector<32x64xbf16>, vector<64x128xbf16>, vector<32x128xf32> -> vector<32x128xf32>
    %c0_143 = arith.constant 0 : index
    %c0_144 = arith.constant 0 : index
    %327 = vector.load %arg16[%c0_143, %c0_144] : memref<1x128xf32, #tpu.memory_space<vmem>>, vector<1x128xf32>
    %328 = vector.broadcast %327 : vector<1x128xf32> to vector<32x128xf32>
    %329 = arith.addf %326, %328 : vector<32x128xf32>
    %c0_145 = arith.constant 0 : index
    %c0_146 = arith.constant 0 : index
    %330 = vector.load %arg17[%c0_145, %c0_146] : memref<32x128xf32, #tpu.memory_space<vmem>>, vector<32x128xf32>
    tpu.vector_store %arg17[%c0_145, %c0_146], %329 {strides = array<i32>} : memref<32x128xf32, #tpu.memory_space<vmem>>, vector<32x128xf32>,
    return
  }
}

</mosaic_0001>

<bundles_post_ra>
// kernel: gpt_forward.1
= control target key start
LH: loop header
LB: loop body
LE: loop exit
PB: predicated region body
PF: predicated region fallthrough
CT: control target
= control target key end

     0   :  { %s4348_s0 = inlined_call_operand.vmem [shape: f32[32,64], index: 0, kind: input, shape index: {}]   ;;  %s4349_s1 = inlined_call_operand.vmem [shape: f32[32,128], index: 1, kind: input, shape index: {}]   ;;  %s4350_s2 = inlined_call_operand.vmem [shape: bf16[128,64], index: 2, kind: input, shape index: {}]   ;;  %s4351_s3 = inlined_call_operand.vmem [shape: f32[2,1,64], index: 3, kind: input, shape index: {}]   ;;  %s4352_s4 = inlined_call_operand.vmem [shape: bf16[2,64,192], index: 4, kind: input, shape index: {}]   ;;  %s4353_s5 = inlined_call_operand.vmem [shape: bf16[2,64,64], index: 5, kind: input, shape index: {}]   ;;  %s4354_s6 = inlined_call_operand.vmem [shape: f32[2,1,64], index: 6, kind: input, shape index: {}]   ;;  %s4355_s7 = inlined_call_operand.vmem [shape: f32[2,1,64], index: 7, kind: input, shape index: {}]   ;;  %s4356_s8 = inlined_call_operand.vmem [shape: f32[2,1,64], index: 8, kind: input, shape index: {}]   ;;  %s4357_s9 = inlined_call_operand.vmem [shape: bf16[2,64,256], index: 9, kind: input, shape index: {}]   ;;  %s4358_s10 = inlined_call_operand.vmem [shape: f32[2,1,256], index: 10, kind: input, shape index: {}]   ;;  %s4359_s11 = inlined_call_operand.vmem [shape: bf16[2,256,64], index: 11, kind: input, shape index: {}]   ;;  %s4360_s12 = inlined_call_operand.vmem [shape: f32[2,1,64], index: 12, kind: input, shape index: {}]   ;;  %s4361_s13 = inlined_call_operand.vmem [shape: f32[2,1,64], index: 13, kind: input, shape index: {}]   ;;  %s4362_s14 = inlined_call_operand.vmem [shape: f32[1,64], index: 14, kind: input, shape index: {}]   ;;  %s4363_s15 = inlined_call_operand.vmem [shape: bf16[64,128], index: 15, kind: input, shape index: {}]   ;;  %s4364_s16 = inlined_call_operand.vmem [shape: f32[1,128], index: 16, kind: input, shape index: {}]   ;;  %s4365_s17 = inlined_call_operand.hbm [shape: f32[32,128], index: 17, kind: output, shape index: {}]  }
   0x1   :  { %4368 = sst [smem:[#allocation5_spill]] %s4348_s0 }
   0x2   :  { %4369 = sst [smem:[#allocation6_spill]] %s4349_s1 }
   0x3   :  { %s4370_s26 = sld [smem:[#allocation5_spill]]  ;;  %vm83_vm0 = vcmask 523264   ;;  %v3047_v16 = vld [vmem:[%s4352_s4 + $0x4] ss:$8 sps:$4 sm:$0xff]   ;;  %v3049_v17 = vld [vmem:[%s4352_s4] ss:$8 sps:$4 sm:$0xff]  }
   0x4   :  { %211 = vmatprep.subr.bf16.mxu1 %v3047_v16  ;;  %v3050_v18 = vld [vmem:[%s4352_s4 + $0x14] ss:$8 sps:$4 sm:$0xff]   ;;  %v3052_v19 = vld [vmem:[%s4352_s4 + $0x10] ss:$8 sps:$4 sm:$0xff]   ;;  %v3053_v20 = vld [vmem:[%s4352_s4 + $0x24] ss:$8 sps:$4 sm:$0xff]  }
   0x5   :  { %212 = vmatpush1.bf16.msra.mxu1 %v3049_v17  ;;  %v3055_v21 = vld [vmem:[%s4352_s4 + $0x20] ss:$8 sps:$4 sm:$0xff]   ;;  %v3056_v22 = vld [vmem:[%s4352_s4 + $0x34] ss:$8 sps:$4 sm:$0xff]   ;;  %v3058_v23 = vld [vmem:[%s4352_s4 + $0x30] ss:$8 sps:$4 sm:$0xff]  }
   0x6   :  { %213 = vmatprep.subr.bf16.mxu1 %v3050_v18  ;;  %v3323_v24 = vmov 0  }
   0x7   :  { %243 = vmatprep.mubr.bf16.mxu1 %v3323_v24 }
   0x9   :  { %v3421_v0 = vld [vmem:[%s4370_s26] sm:$0xff]  ;;  %v3426_v1 = vld [vmem:[%s4370_s26 + $0x8] sm:$0xff]  ;;  %v3431_v2 = vld [vmem:[%s4370_s26 + $0x10] sm:$0xff]  ;;  %214 = vmatpush1.bf16.msra.mxu1 %v3052_v19 }
   0xa   :  { %v84_v3 = vsel %vm83_vm0, %v3421_v0, 0.0  ;;  %v101_v4 = vmul.f32 %v3421_v0, %v3421_v0  ;;  %v102_v5 = vmul.f32 %v3426_v1, %v3426_v1  ;;  %v3442_v6 = vld [vmem:[%s4370_s26 + $0x18] sm:$0xff]  ;;  %v87_v7 = vsel %vm83_vm0, %v3426_v1, 0.0  ;;  %215 = vmatprep.subr.bf16.mxu1 %v3053_v20 }
   0xb   :  { %85 = vadd.xlane.f32.xlu0 %v84_v3  ;;  %v103_v8 = vmul.f32 %v3431_v2, %v3431_v2  ;;  %v90_v10 = vsel %vm83_vm0, %v3431_v2, 0.0  ;;  %v93_v11 = vsel %vm83_vm0, %v3442_v6, 0.0  ;;  %v104_v14 = vmul.f32 %v3442_v6, %v3442_v6 }
   0xc   :  { %v105_v9 = vsel %vm83_vm0, %v101_v4, 0.0  ;;  %v108_v12 = vsel %vm83_vm0, %v102_v5, 0.0 }
   0xd   :  { %106 = vadd.xlane.f32.xlu1 %v105_v9  ;;  %v111_v13 = vsel %vm83_vm0, %v103_v8, 0.0  ;;  %v114_v15 = vsel %vm83_vm0, %v104_v14, 0.0  ;;  %216 = vmatpush1.bf16.msra.mxu1 %v3055_v21 }
   0xe   :  { %217 = vmatprep.subr.bf16.mxu1 %v3056_v22 }
   0xf   :  { %88 = vadd.xlane.f32.xlu0 %v87_v7 }
  0x11   :  { %109 = vadd.xlane.f32.xlu1 %v108_v12  ;;  %218 = vmatpush1.bf16.msra.mxu1 %v3058_v23 }
  0x13   :  { %91 = vadd.xlane.f32.xlu0 %v90_v10 }
  0x15   :  { %94 = vadd.xlane.f32.xlu1 %v93_v11 }
  0x17   :  { %112 = vadd.xlane.f32.xlu0 %v111_v13 }
  0x19   :  { %115 = vadd.xlane.f32.xlu1 %v114_v15 }
  0x1a   :  { %22 = vsyncpa [#allocation3], 0  ;;  %v3486_v25 = vld [vmem:[%s4350_s2 + $0x8] sm:$0xff]   ;;  %v3491_v26 = vld [vmem:[%s4350_s2] sm:$0xff]   ;;  %s3324_s24 = smov 64   ;;  %s4371_s29 = sld [smem:[#allocation6_spill]] }
  0x1b   :  { %v3500_v27 = vld [vmem:[%s4350_s2 + $0x10] sm:$0xff]   ;;  %v3505_v28 = vld [vmem:[%s4350_s2 + $0x20] sm:$0xff]   ;;  %2890 = vmatprep.subr.bf16.mxu0 %v3491_v26  ;;  %v3517_v29 = vld [vmem:[%s4350_s2 + $0x18] sm:$0xff]   ;;  %s3325_s23 = smov [#allocation2]  }
  0x1c   :  { %2891 = vmatpush3.bf16.msra.mxu0 %v3491_v26  ;;  %v3522_v30 = vld [vmem:[%s4350_s2 + $0x30] sm:$0xff]   ;;  %v3533_v31 = vld [vmem:[%s4350_s2 + $0x28] sm:$0xff]   ;;  %v3542_v32 = vld [vmem:[%s4350_s2 + $0x38] sm:$0xff]  }
  0x1d   :  { %2892 = vmatprep.subr.bf16.mxu0 %v3486_v25  ;;  %v2557_v5 = vld [vmem:[%s4351_s3] ss:$0 sm:$0xff] }
  0x20   :  { %2893 = vmatpush3.bf16.msra.mxu0 %v3486_v25 }
  0x21   :  { %2894 = vmatprep.subr.bf16.mxu0 %v3500_v27 }
  0x24   :  { %2895 = vmatpush3.bf16.msra.mxu0 %v3500_v27 }
  0x25   :  { %2896 = vmatprep.subr.bf16.mxu0 %v3517_v29 }
  0x28   :  { %2897 = vmatpush3.bf16.msra.mxu0 %v3517_v29 }
  0x29   :  { %2898 = vmatprep.subr.bf16.mxu0 %v3505_v28 }
  0x2a   :  { %310 = vrot.lane.b32.xlu1 %v3486_v25, %s3324_s24 }
  0x2c   :  { %2899 = vmatpush3.bf16.msra.mxu0 %v3505_v28 }
  0x2d   :  { %308 = vrot.lane.b32.xlu0 %v3491_v26, %s3324_s24  ;;  %2900 = vmatprep.subr.bf16.mxu0 %v3533_v31 }
  0x2e   :  { %312 = vrot.lane.b32.xlu1 %v3500_v27, %s3324_s24 }
  0x30   :  { %2901 = vmatpush3.bf16.msra.mxu0 %v3533_v31 }
  0x31   :  { %316 = vrot.lane.b32.xlu0 %v3505_v28, %s3324_s24  ;;  %2902 = vmatprep.subr.bf16.mxu0 %v3522_v30 }
  0x32   :  { %314 = vrot.lane.b32.xlu1 %v3517_v29, %s3324_s24 }
  0x34   :  { %2903 = vmatpush3.bf16.msra.mxu0 %v3522_v30 }
  0x35   :  { %320 = vrot.lane.b32.xlu0 %v3522_v30, %s3324_s24  ;;  %2904 = vmatprep.subr.bf16.mxu0 %v3542_v32 }
  0x36   :  { %318 = vrot.lane.b32.xlu1 %v3533_v31, %s3324_s24 }
  0x38   :  { %2905 = vmatpush3.bf16.msra.mxu0 %v3542_v32 }
  0x3a   :  { %322 = vrot.lane.b32.xlu1 %v3542_v32, %s3324_s24 }
  0x98   :  { %v86_v33 = vpop.xlane.xlu0 %85 }
  0x99   :  { %v97_v34 = vmul.f32 0.015625, %v86_v33 }
  0x9a   :  { %v107_v35 = vpop.xlane.xlu1 %106 }
  0x9b   :  { %v121_v36 = vmul.f32 %v97_v34, %v97_v34  ;;  %v117_v37 = vmul.f32 0.015625, %v107_v35  ;;  %v129_v62 = vsub.f32 %v3421_v0, %v97_v34 }
  0x9c   :  { %v89_v38 = vpop.xlane.xlu0 %88 }
  0x9d   :  { %v125_v39 = vsub.f32 %v117_v37, %v121_v36  ;;  %v98_v40 = vmul.f32 0.015625, %v89_v38 }
  0x9e   :  { %v110_v41 = vpop.xlane.xlu1 %109 }
  0x9f   :  { %v133_v42 = vadd.f32 1e-05, %v125_v39  ;;  %v122_v43 = vmul.f32 %v98_v40, %v98_v40  ;;  %v118_v44 = vmul.f32 0.015625, %v110_v41  ;;  %v130_v63 = vsub.f32 %v3426_v1, %v98_v40 }
  0xa0   :  { %v92_v45 = vpop.xlane.xlu0 %91 }
  0xa1   :  { %3147 = vrsqrt.f32 %v133_v42  ;;  %v126_v46 = vsub.f32 %v118_v44, %v122_v43  ;;  %v99_v47 = vmul.f32 0.015625, %v92_v45 }
  0xa2   :  { %v95_v48 = vpop.xlane.xlu1 %94 }
  0xa3   :  { %v134_v49 = vadd.f32 1e-05, %v126_v46  ;;  %v123_v50 = vmul.f32 %v99_v47, %v99_v47  ;;  %v100_v51 = vmul.f32 0.015625, %v95_v48  ;;  %v131_v10 = vsub.f32 %v3431_v2, %v99_v47 }
  0xa4   :  { %v113_v52 = vpop.xlane.xlu0 %112 }
  0xa5   :  { %3149 = vrsqrt.f32 %v134_v49  ;;  %v119_v53 = vmul.f32 0.015625, %v113_v52  ;;  %v124_v55 = vmul.f32 %v100_v51, %v100_v51  ;;  %v132_v13 = vsub.f32 %v3442_v6, %v100_v51 }
  0xa6   :  { %v116_v54 = vpop.xlane.xlu1 %115 }
  0xa7   :  { %v127_v56 = vsub.f32 %v119_v53, %v123_v50  ;;  %v120_v57 = vmul.f32 0.015625, %v116_v54 }
  0xa8   :  { %v3567_v20 = vpop.permute.xlu0 %308 }
  0xa9   :  { %v135_v58 = vadd.f32 1e-05, %v127_v56  ;;  %v128_v59 = vsub.f32 %v120_v57, %v124_v55 }
  0xaa   :  { %v3565_v18 = vpop.permute.xlu1 %310 }
  0xab   :  { %v3148_v60 = vpop.eup %3147  ;;  %3151 = vrsqrt.f32 %v135_v58  ;;  %v136_v61 = vadd.f32 1e-05, %v128_v59 }
  0xac   :  { %v141_v3 = vmul.f32 %v3148_v60, %v129_v62  ;;  %v3580_v36 = vpop.permute.xlu0 %316 }
  0xad   :  { %3153 = vrsqrt.f32 %v136_v61 }
  0xae   :  { %v151_v8 = vmul.f32 %v2557_v5, %v141_v3  ;;  %v3569_v23 = vpop.permute.xlu1 %312 }
  0xaf   :  { %v3150_v4 = vpop.eup %3149 }
  0xb0   :  { %v142_v7 = vmul.f32 %v3150_v4, %v130_v63  ;;  %v3591_v47 = vpop.permute.xlu0 %320 }
  0xb2   :  { %v152_v9 = vmul.f32 %v2557_v5, %v142_v7  ;;  %v3584_v40 = vpop.permute.xlu1 %314 }
  0xb4   :  { %v163_v11 = vpack.c.bf16 %v152_v9, %v151_v8 }
  0xb5   :  { %v3152_v12 = vpop.eup %3151 }
  0xb6   :  { %2566 = vmatmul.mubr.msk.bf16.vlgmr.msra.gmra.mrb[0].mxu1 %vm83_vm0, %v163_v11  ;;  %v143_v0 = vmul.f32 %v3152_v12, %v131_v10  ;;  %v3595_v48 = vpop.permute.xlu1 %318  ;;  %v62_v10 = vld [vmem:[%s4371_s29] sm:$0xff] }
  0xb7   :  { %v3154_v14 = vpop.eup %3153  ;;  %253 = vmatprep.mubr.bf16.mxu1 %v3323_v24 }
  0xb8   :  { %v144_v1 = vmul.f32 %v3154_v14, %v132_v13  ;;  %v153_v15 = vmul.f32 %v2557_v5, %v143_v0  ;;  %v63_v13 = vld [vmem:[%s4371_s29 + $0x8] sm:$0xff] }
  0xba   :  { %v154_v16 = vmul.f32 %v2557_v5, %v144_v1  ;;  %v3602_v52 = vpop.permute.xlu1 %322  ;;  %v64_v1 = vld [vmem:[%s4371_s29 + $0x10] sm:$0xff] }
  0xbc   :  { %v164_v17 = vpack.c.bf16 %v154_v16, %v153_v15 }
  0xbe   :  { %2567 = vmatmul.mubr.msk.bf16.gmra.mrb[4].mxu1 %vm83_vm0, %v164_v17 }
 0x189   :  { %v245_v19 = vpop.f32.mrb[0].mxu1 }
 0x18a   :  { %v247_v2 = vpop.f32.mrb[1].mxu1 }
 0x18b   :  { %v249_v21 = vpop.f32.mrb[2].mxu1 }
 0x18c   :  { %v264_v6 = vpack.c.bf16 %v249_v21, %v245_v19  ;;  %v251_v22 = vpop.f32.mrb[3].mxu1  ;;  %v65_v19 = vld [vmem:[%s4371_s29 + $0x18] sm:$0xff] }
 0x18d   :  { %v3571_v33 = vpack.c.bf16 %v251_v22, %v247_v2 }
 0x18e   :  { %2886 = vmatprep.mubr.msk.bf16.mxu1 %vm83_vm0, %v264_v6  ;;  %v332_v34 = vmul.bf16 %v3567_v20, %v264_v6  ;;  %v334_v39 = vmul.bf16 %v3569_v23, %v264_v6  ;;  %v336_v46 = vmul.bf16 %v3580_v36, %v264_v6  ;;  %v338_v49 = vmul.bf16 %v3591_v47, %v264_v6 }
 0x18f   :  { %v3577_v35 = vmul.bf16 %v3491_v26, %v3571_v33 }
 0x190   :  { %364 = vrot.lane.b32.xlu0 %v332_v34, %s3324_s24 }
 0x191   :  { %v255_v37 = vpop.f32.mrb[4].mxu1  ;;  %2910 = vmatprep.subr.bf16.mxu0 %v3577_v35 }
 0x192   :  { %v257_v38 = vpop.f32.mrb[5].mxu1 }
 0x193   :  { %v259_v41 = vpop.f32.mrb[6].mxu1 }
 0x194   :  { %v265_v42 = vpack.c.bf16 %v259_v41, %v255_v37  ;;  %v261_v43 = vpop.f32.mrb[7].mxu1  ;;  %368 = vrot.lane.b32.xlu0 %v334_v39, %s3324_s24 }
 0x195   :  { %v3587_v44 = vpack.c.bf16 %v261_v43, %v257_v38 }
 0x196   :  { %v333_v45 = vmul.bf16 %v3565_v18, %v265_v42  ;;  %v335_v50 = vmul.bf16 %v3584_v40, %v265_v42  ;;  %v337_v51 = vmul.bf16 %v3595_v48, %v265_v42  ;;  %v339_v53 = vmul.bf16 %v3602_v52, %v265_v42 }
 0x198   :  { %366 = vrot.lane.b32.xlu1 %v333_v45, %s3324_s24  ;;  %372 = vrot.lane.b32.xlu0 %v336_v46, %s3324_s24 }
 0x19c   :  { %370 = vrot.lane.b32.xlu1 %v335_v50, %s3324_s24  ;;  %376 = vrot.lane.b32.xlu0 %v338_v49, %s3324_s24 }
 0x1a0   :  { %374 = vrot.lane.b32.xlu1 %v337_v51, %s3324_s24 }
 0x1a4   :  { %378 = vrot.lane.b32.xlu1 %v339_v53, %s3324_s24 }
 0x202   :  { %v365_v54 = vpop.permute.xlu0 %364 }
 0x203   :  { %v387_v55 = vsel %vm83_vm0, %v365_v54, 0  ;;  %3026 = vmatprep.subr.msk.bf16.mxu1 %vm83_vm0, %v365_v54 }
 0x204   :  { %2871 = vmatpush3.bf16.xpose.msra.mxu1 %v387_v55 }
 0x206   :  { %v369_v58 = vpop.permute.xlu0 %368 }
 0x207   :  { %v393_v59 = vsel %vm83_vm0, %v369_v58, 0 }
 0x20a   :  { %v367_v56 = vpop.permute.xlu1 %366  ;;  %v373_v62 = vpop.permute.xlu0 %372 }
 0x20b   :  { %v390_v57 = vsel %vm83_vm0, %v367_v56, 0  ;;  %3027 = vmatprep.subr.msk.bf16.mxu1 %vm83_vm0, %v367_v56  ;;  %v399_v63 = vsel %vm83_vm0, %v373_v62, 0  ;;  %v349_v56 = vmul.bf16 %v3486_v25, %v3587_v44  ;;  %v353_v25 = vmul.bf16 %v3533_v31, %v3587_v44  ;;  %v3068_v31 = vld [vmem:[%s4353_s5 + $0x8] sm:$0xff]  }
 0x20c   :  { %2873 = vmatpush3.bf16.xpose.msra.mxu1 %v390_v57  ;;  %v350_v57 = vmul.bf16 %v3500_v27, %v3571_v33  ;;  %v354_v27 = vmul.bf16 %v3522_v30, %v3571_v33  ;;  %v3069_v30 = vld [vmem:[%s4353_s5 + $0x10] sm:$0xff]  }
 0x20d   :  { %3028 = vmatprep.subr.msk.bf16.mxu1 %vm83_vm0, %v369_v58  ;;  %v351_v58 = vmul.bf16 %v3517_v29, %v3587_v44  ;;  %v355_v29 = vmul.bf16 %v3542_v32, %v3587_v44  ;;  %v3070_v32 = vld [vmem:[%s4353_s5 + $0x18] sm:$0xff]  }
 0x20e   :  { %v371_v60 = vpop.permute.xlu1 %370  ;;  %v377_v5 = vpop.permute.xlu0 %376 }
 0x20f   :  { %v396_v61 = vsel %vm83_vm0, %v371_v60, 0  ;;  %v405_v7 = vsel %vm83_vm0, %v377_v5, 0 }
 0x212   :  { %v375_v3 = vpop.permute.xlu1 %374 }
 0x213   :  { %v402_v4 = vsel %vm83_vm0, %v375_v3, 0 }
 0x214   :  { %2875 = vmatpush3.bf16.xpose.msra.mxu1 %v393_v59  ;;  %v352_v59 = vmul.bf16 %v3505_v28, %v3571_v33  ;;  %v3067_v28 = vld [vmem:[%s4353_s5] sm:$0xff]  }
 0x215   :  { %3029 = vmatprep.subr.msk.bf16.mxu1 %vm83_vm0, %v371_v60 }
 0x216   :  { %v379_v8 = vpop.permute.xlu1 %378 }
 0x217   :  { %v408_v9 = vsel %vm83_vm0, %v379_v8, 0 }
 0x21c   :  { %2877 = vmatpush3.bf16.xpose.msra.mxu1 %v396_v61 }
 0x21d   :  { %3030 = vmatprep.subr.msk.bf16.mxu1 %vm83_vm0, %v373_v62 }
 0x224   :  { %2879 = vmatpush3.bf16.xpose.msra.mxu1 %v399_v63 }
 0x225   :  { %3031 = vmatprep.subr.msk.bf16.mxu1 %vm83_vm0, %v375_v3 }
 0x22c   :  { %2881 = vmatpush3.bf16.xpose.msra.mxu1 %v402_v4 }
 0x22d   :  { %3032 = vmatprep.subr.msk.bf16.mxu1 %vm83_vm0, %v377_v5 }
 0x234   :  { %2883 = vmatpush3.bf16.xpose.msra.mxu1 %v405_v7 }
 0x235   :  { %3033 = vmatprep.subr.msk.bf16.mxu1 %vm83_vm0, %v379_v8 }
 0x23c   :  { %2885 = vmatpush3.bf16.xpose.msra.mxu1 %v408_v9 }
 0x23d   :  { %2930 = vmatprep.subr.bf16.mxu1 %v3067_v28 }
 0x243   :  { %2887 = vmatmul.mubr.msk.bf16.vlgmr.msra.gmra.mrb[8].mxu1 %vm83_vm0, %v265_v42 }
 0x244   :  { %2931 = vmatpush3.bf16.msra.mxu1 %v3067_v28 }
 0x245   :  { %2932 = vmatprep.subr.bf16.mxu1 %v3068_v31 }
 0x248   :  { %2933 = vmatpush3.bf16.msra.mxu1 %v3068_v31 }
 0x249   :  { %2934 = vmatprep.subr.bf16.mxu1 %v3069_v30 }
 0x24c   :  { %2935 = vmatpush3.bf16.msra.mxu1 %v3069_v30 }
 0x24d   :  { %2936 = vmatprep.subr.bf16.mxu1 %v3070_v32 }
 0x250   :  { %2937 = vmatpush3.bf16.msra.mxu1 %v3070_v32 }
 0x316   :  { %v2888_v11 = vpop.f32.mrb[8].mxu1 }
 0x317   :  { %v444_v12 = vpop.f32.mrb[9].mxu1  ;;  %v453_v17 = vadd.f32 %v2888_v11, %v64_v1 }
 0x318   :  { %v445_v0 = vadd.f32 %v444_v12, %v62_v10  ;;  %v2889_v14 = vpop.f32.mrb[10].mxu1 }
 0x319   :  { %v447_v15 = vpop.f32.mrb[11].mxu1  ;;  %v456_v2 = vadd.f32 %v2889_v14, %v65_v19 }
 0x31a   :  { %v448_v16 = vadd.f32 %v447_v15, %v63_v13  ;;  %459 = vmax.xlane.f32.xlu0 %v445_v0 }
 0x31c   :  { %461 = vmax.xlane.f32.xlu1 %v448_v16 }
 0x31e   :  { %463 = vmax.xlane.f32.xlu0 %v453_v17 }
 0x322   :  { %465 = vmax.xlane.f32.xlu0 %v456_v2 }
 0x3a7   :  { %v460_v21 = vpop.xlane.xlu0 %459 }
 0x3a8   :  { %v467_v6 = vsub.f32 %v445_v0, %v460_v21 }
 0x3a9   :  { %v462_v22 = vpop.xlane.xlu1 %461 }
 0x3aa   :  { %v471_v34 = vmul.f32 1.442695, %v467_v6  ;;  %v468_v37 = vsub.f32 %v448_v16, %v462_v22 }
 0x3ab   :  { %v464_v38 = vpop.xlane.xlu0 %463 }
 0x3ac   :  { %v473_v39 = vmul.f32 1.442695, %v468_v37  ;;  %v469_v41 = vsub.f32 %v453_v17, %v464_v38  ;;  %3155 = vpow2.f32 %v471_v34  ;;  %v2578_v17 = vld [vmem:[%s4354_s6] ss:$0 sm:$0xff] }
 0x3ae   :  { %3157 = vpow2.f32 %v473_v39  ;;  %v475_v42 = vmul.f32 1.442695, %v469_v41 }
 0x3af   :  { %v466_v43 = vpop.xlane.xlu0 %465 }
 0x3b0   :  { %v470_v45 = vsub.f32 %v456_v2, %v466_v43  ;;  %3159 = vpow2.f32 %v475_v42 }
 0x3b2   :  { %v477_v46 = vmul.f32 1.442695, %v470_v45 }
 0x3b4   :  { %3161 = vpow2.f32 %v477_v46 }
 0x3b6   :  { %v3156_v49 = vpop.eup %3155 }
 0x3b8   :  { %v3158_v50 = vpop.eup %3157 }
 0x3b9   :  { %v479_v51 = vpack.c.bf16 %v3158_v50, %v3156_v49 }
 0x3ba   :  { %v3160_v53 = vpop.eup %3159 }
 0x3bb   :  { %2906 = vmatprep.mubr.bf16.mxu0 %v479_v51 }
 0x3be   :  { %v3162_v54 = vpop.eup %3161 }
 0x3bf   :  { %v480_v55 = vpack.c.bf16 %v3162_v54, %v3160_v53 }
 0x3c1   :  { %2907 = vmatmul.mubr.bf16.vlgmr.msra.gmra.mrb[0].mxu0 %v480_v55 }
 0x3c2   :  { %2911 = vmatpush3.bf16.msra.mxu0 %v3577_v35  ;;  %2926 = vmatprep.mubr.bf16.mxu0 %v479_v51 }
 0x3c3   :  { %2912 = vmatprep.subr.bf16.mxu0 %v349_v56 }
 0x3c6   :  { %2913 = vmatpush3.bf16.msra.mxu0 %v349_v56 }
 0x3c7   :  { %2914 = vmatprep.subr.bf16.mxu0 %v350_v57 }
 0x3ca   :  { %2915 = vmatpush3.bf16.msra.mxu0 %v350_v57 }
 0x3cb   :  { %2916 = vmatprep.subr.bf16.mxu0 %v351_v58 }
 0x3ce   :  { %2917 = vmatpush3.bf16.msra.mxu0 %v351_v58 }
 0x3cf   :  { %2918 = vmatprep.subr.bf16.mxu0 %v352_v59 }
 0x3d2   :  { %2919 = vmatpush3.bf16.msra.mxu0 %v352_v59 }
 0x3d3   :  { %2920 = vmatprep.subr.bf16.mxu0 %v353_v25 }
 0x3d6   :  { %2921 = vmatpush3.bf16.msra.mxu0 %v353_v25 }
 0x3d7   :  { %2922 = vmatprep.subr.bf16.mxu0 %v354_v27 }
 0x3da   :  { %2923 = vmatpush3.bf16.msra.mxu0 %v354_v27 }
 0x3db   :  { %2924 = vmatprep.subr.bf16.mxu0 %v355_v29 }
 0x3de   :  { %2925 = vmatpush3.bf16.msra.mxu0 %v355_v29 }
 0x3e1   :  { %2927 = vmatmul.mubr.bf16.vlgmr.msra.gmra.mrb[4].mxu0 %v480_v55 }
 0x3e2   :  { %933 = vmatprep.mubr.bf16.mxu0 %v3323_v24 }
 0x494   :  { %v2908_v33 = vpop.f32.mrb[0].mxu0 }
 0x495   :  { %v515_v35 = vpop.f32.mrb[1].mxu0  ;;  %v581_v61 = vmax.f32 %v2908_v33, 1e-20 }
 0x496   :  { %v2909_v44 = vpop.f32.mrb[2].mxu0  ;;  %v579_v62 = vmax.f32 %v515_v35, 1e-20 }
 0x497   :  { %v518_v60 = vpop.f32.mrb[3].mxu0  ;;  %v582_v63 = vmax.f32 %v2909_v44, 1e-20  ;;  %3163 = vrcp.f32 %v581_v61 }
 0x498   :  { %v580_v3 = vmax.f32 %v518_v60, 1e-20  ;;  %3165 = vrcp.f32 %v579_v62 }
 0x499   :  { %3167 = vrcp.f32 %v582_v63 }
 0x49a   :  { %3169 = vrcp.f32 %v580_v3 }
 0x4a1   :  { %v3164_v4 = vpop.eup %3163 }
 0x4a2   :  { %v3166_v7 = vpop.eup %3165 }
 0x4a3   :  { %v3168_v10 = vpop.eup %3167 }
 0x4a4   :  { %v3170_v13 = vpop.eup %3169 }
 0x4b4   :  { %v2928_v5 = vpop.f32.mrb[4].mxu0 }
 0x4b5   :  { %v589_v8 = vmul.f32 %v3164_v4, %v2928_v5  ;;  %v564_v9 = vpop.f32.mrb[5].mxu0 }
 0x4b6   :  { %v587_v11 = vmul.f32 %v3166_v7, %v564_v9  ;;  %v2929_v12 = vpop.f32.mrb[6].mxu0 }
 0x4b7   :  { %v590_v0 = vmul.f32 %v3168_v10, %v2929_v12  ;;  %v567_v14 = vpop.f32.mrb[7].mxu0 }
 0x4b8   :  { %v588_v1 = vmul.f32 %v3170_v13, %v567_v14 }
 0x4b9   :  { %v600_v15 = vpack.c.bf16 %v590_v0, %v589_v8 }
 0x4ba   :  { %v599_v16 = vpack.c.bf16 %v588_v1, %v587_v11  ;;  %v2585_v1 = vld [vmem:[%s4355_s7] ss:$0 sm:$0xff] }
 0x4bc   :  { %2938 = vmatprep.mubr.msk.bf16.mxu1 %vm83_vm0, %v599_v16 }
 0x4bd   :  { %2939 = vmatmul.mubr.msk.bf16.vlgmr.msra.gmra.mrb[12].mxu1 %vm83_vm0, %v600_v15 }
 0x590   :  { %v2940_v19 = vpop.f32.mrb[12].mxu1 }
 0x591   :  { %v672_v2 = vpop.f32.mrb[13].mxu1  ;;  %v3681_v42 = vadd.f32 %v2940_v19, %v2578_v17 }
 0x592   :  { %v3669_v21 = vadd.f32 %v2578_v17, %v672_v2  ;;  %v2941_v6 = vpop.f32.mrb[14].mxu1 }
 0x593   :  { %v675_v22 = vpop.f32.mrb[15].mxu1  ;;  %v3684_v45 = vadd.f32 %v2941_v6, %v2578_v17  ;;  %v694_v49 = vsel %vm83_vm0, %v3681_v42, 0.0  ;;  %v706_v50 = vmul.f32 %v3681_v42, %v3681_v42  ;;  %v3283_v6 = vld [vmem:[%s4370_s26] sm:$0xff] }
 0x594   :  { %v3671_v34 = vadd.f32 %v2578_v17, %v675_v22  ;;  %v688_v37 = vsel %vm83_vm0, %v3669_v21, 0.0  ;;  %v704_v38 = vmul.f32 %v3669_v21, %v3669_v21 }
 0x595   :  { %689 = vadd.xlane.f32.xlu0 %v688_v37  ;;  %v697_v51 = vsel %vm83_vm0, %v3684_v45, 0.0  ;;  %v707_v53 = vmul.f32 %v3684_v45, %v3684_v45  ;;  %v714_v54 = vsel %vm83_vm0, %v706_v50, 0.0 }
 0x596   :  { %v691_v39 = vsel %vm83_vm0, %v3671_v34, 0.0  ;;  %v705_v41 = vmul.f32 %v3671_v34, %v3671_v34  ;;  %v708_v43 = vsel %vm83_vm0, %v704_v38, 0.0 }
 0x597   :  { %692 = vadd.xlane.f32.xlu1 %v691_v39  ;;  %v717_v55 = vsel %vm83_vm0, %v707_v53, 0.0 }
 0x598   :  { %v711_v46 = vsel %vm83_vm0, %v705_v41, 0.0 }
 0x599   :  { %709 = vadd.xlane.f32.xlu0 %v708_v43 }
 0x59b   :  { %712 = vadd.xlane.f32.xlu1 %v711_v46 }
 0x59d   :  { %695 = vadd.xlane.f32.xlu0 %v694_v49 }
 0x59f   :  { %698 = vadd.xlane.f32.xlu1 %v697_v51 }
 0x5a1   :  { %715 = vadd.xlane.f32.xlu0 %v714_v54 }
 0x5a3   :  { %718 = vadd.xlane.f32.xlu1 %v717_v55 }
 0x622   :  { %v690_v56 = vpop.xlane.xlu0 %689 }
 0x623   :  { %v700_v57 = vmul.f32 0.015625, %v690_v56 }
 0x624   :  { %v693_v58 = vpop.xlane.xlu1 %692 }
 0x625   :  { %v701_v59 = vmul.f32 0.015625, %v693_v58  ;;  %v724_v27 = vmul.f32 %v700_v57, %v700_v57  ;;  %v732_v0 = vsub.f32 %v3669_v21, %v700_v57 }
 0x626   :  { %v710_v25 = vpop.xlane.xlu0 %709 }
 0x627   :  { %v720_v29 = vmul.f32 0.015625, %v710_v25  ;;  %v725_v31 = vmul.f32 %v701_v59, %v701_v59  ;;  %v733_v15 = vsub.f32 %v3671_v34, %v701_v59  ;;  %v3284_v34 = vld [vmem:[%s4370_s26 + $0x8] sm:$0xff]  ;;  %v3286_v25 = vld [vmem:[%s4370_s26 + $0x18] sm:$0xff] }
 0x628   :  { %v713_v28 = vpop.xlane.xlu1 %712 }
 0x629   :  { %v728_v30 = vsub.f32 %v720_v29, %v724_v27  ;;  %v721_v32 = vmul.f32 0.015625, %v713_v28 }
 0x62a   :  { %v696_v33 = vpop.xlane.xlu0 %695 }
 0x62b   :  { %v736_v35 = vadd.f32 1e-05, %v728_v30  ;;  %v729_v44 = vsub.f32 %v721_v32, %v725_v31  ;;  %v702_v60 = vmul.f32 0.015625, %v696_v33  ;;  %v3073_v33 = vld [vmem:[%s4357_s9 + $0x4] ss:$8 sps:$4 sm:$0xff]  }
 0x62c   :  { %v699_v61 = vpop.xlane.xlu1 %698  ;;  %901 = vmatprep.subr.bf16.mxu0 %v3073_v33 }
 0x62d   :  { %3171 = vrsqrt.f32 %v736_v35  ;;  %v737_v62 = vadd.f32 1e-05, %v729_v44  ;;  %v703_v63 = vmul.f32 0.015625, %v699_v61  ;;  %v726_v4 = vmul.f32 %v702_v60, %v702_v60  ;;  %v3071_v35 = vld [vmem:[%s4357_s9] ss:$8 sps:$4 sm:$0xff]  }
 0x62e   :  { %v716_v3 = vpop.xlane.xlu0 %715  ;;  %v734_v21 = vsub.f32 %v3681_v42, %v702_v60  ;;  %902 = vmatpush1.bf16.msra.mxu0 %v3071_v35  ;;  %v3076_v44 = vld [vmem:[%s4357_s9 + $0x14] ss:$8 sps:$4 sm:$0xff]   ;;  %v3074_v60 = vld [vmem:[%s4357_s9 + $0x10] ss:$8 sps:$4 sm:$0xff]   ;;  %v3079_v61 = vld [vmem:[%s4357_s9 + $0x24] ss:$8 sps:$4 sm:$0xff]  }
 0x62f   :  { %3173 = vrsqrt.f32 %v737_v62  ;;  %v722_v5 = vmul.f32 0.015625, %v716_v3  ;;  %v727_v8 = vmul.f32 %v703_v63, %v703_v63  ;;  %v735_v46 = vsub.f32 %v3684_v45, %v703_v63  ;;  %v3285_v45 = vld [vmem:[%s4370_s26 + $0x10] sm:$0xff]  ;;  %903 = vmatprep.subr.bf16.mxu0 %v3076_v44  ;;  %v3077_v62 = vld [vmem:[%s4357_s9 + $0x20] ss:$8 sps:$4 sm:$0xff]  }
 0x630   :  { %v719_v7 = vpop.xlane.xlu1 %718  ;;  %v3080_v63 = vld [vmem:[%s4357_s9 + $0x30] ss:$8 sps:$4 sm:$0xff]   ;;  %v3082_v3 = vld [vmem:[%s4357_s9 + $0x34] ss:$8 sps:$4 sm:$0xff]  }
 0x631   :  { %v730_v9 = vsub.f32 %v722_v5, %v726_v4  ;;  %v723_v10 = vmul.f32 0.015625, %v719_v7  ;;  %v3083_v4 = vld [vmem:[%s4359_s11 + $0x40] sm:$0xff]   ;;  %v3085_v7 = vld [vmem:[%s4359_s11 + $0x48] sm:$0xff]  }
 0x632   :  { %904 = vmatpush1.bf16.msra.mxu0 %v3074_v60  ;;  %v3084_v5 = vld [vmem:[%s4359_s11] sm:$0xff]   ;;  %2772 = vmatprep.subr.bf16.mxu1 %v3083_v4 }
 0x633   :  { %v738_v11 = vadd.f32 1e-05, %v730_v9  ;;  %v731_v12 = vsub.f32 %v723_v10, %v727_v8  ;;  %905 = vmatprep.subr.bf16.mxu0 %v3079_v61  ;;  %2773 = vmatpush3.bf16.msra.mxu1 %v3084_v5  ;;  %v3086_v8 = vld [vmem:[%s4359_s11 + $0x8] sm:$0xff]   ;;  %v3087_v5 = vld [vmem:[%s4359_s11 + $0x50] sm:$0xff]  }
 0x634   :  { %2774 = vmatprep.subr.bf16.mxu1 %v3085_v7  ;;  %v3088_v7 = vld [vmem:[%s4359_s11 + $0x10] sm:$0xff]  }
 0x635   :  { %3175 = vrsqrt.f32 %v738_v11  ;;  %v739_v13 = vadd.f32 1e-05, %v731_v12 }
 0x636   :  { %906 = vmatpush1.bf16.msra.mxu0 %v3077_v62 }
 0x637   :  { %v3172_v14 = vpop.eup %3171  ;;  %3177 = vrsqrt.f32 %v739_v13  ;;  %907 = vmatprep.subr.bf16.mxu0 %v3082_v3  ;;  %2775 = vmatpush3.bf16.msra.mxu1 %v3086_v8  ;;  %v3089_v8 = vld [vmem:[%s4359_s11 + $0x58] sm:$0xff]  }
 0x638   :  { %v744_v16 = vmul.f32 %v3172_v14, %v732_v0  ;;  %2776 = vmatprep.subr.bf16.mxu1 %v3087_v5 }
 0x639   :  { %v3174_v17 = vpop.eup %3173 }
 0x63a   :  { %v754_v19 = vmul.f32 %v2585_v1, %v744_v16  ;;  %v745_v2 = vmul.f32 %v3174_v17, %v733_v15  ;;  %908 = vmatpush1.bf16.msra.mxu0 %v3080_v63 }
 0x63b   :  { %2777 = vmatpush3.bf16.msra.mxu1 %v3088_v7 }
 0x63c   :  { %v3705_v22 = vadd.f32 %v3283_v6, %v754_v19  ;;  %v755_v37 = vmul.f32 %v2585_v1, %v745_v2  ;;  %2778 = vmatprep.subr.bf16.mxu1 %v3089_v8 }
 0x63e   :  { %v763_v38 = vsel %vm83_vm0, %v3705_v22, 0.0  ;;  %v3713_v39 = vadd.f32 %v3284_v34, %v755_v37  ;;  %v779_v41 = vmul.f32 %v3705_v22, %v3705_v22 }
 0x63f   :  { %v3176_v43 = vpop.eup %3175  ;;  %764 = vadd.xlane.f32.xlu0 %v763_v38 }
 0x640   :  { %v766_v49 = vsel %vm83_vm0, %v3713_v39, 0.0  ;;  %v780_v42 = vmul.f32 %v3713_v39, %v3713_v39  ;;  %v746_v50 = vmul.f32 %v3176_v43, %v734_v21  ;;  %v783_v53 = vsel %vm83_vm0, %v779_v41, 0.0 }
 0x641   :  { %v3178_v51 = vpop.eup %3177  ;;  %767 = vadd.xlane.f32.xlu1 %v766_v49 }
 0x642   :  { %v756_v54 = vmul.f32 %v2585_v1, %v746_v50  ;;  %v747_v55 = vmul.f32 %v3178_v51, %v735_v46  ;;  %v786_v56 = vsel %vm83_vm0, %v780_v42, 0.0 }
 0x643   :  { %784 = vadd.xlane.f32.xlu0 %v783_v53 }
 0x644   :  { %v3727_v57 = vadd.f32 %v3285_v45, %v756_v54  ;;  %v757_v58 = vmul.f32 %v2585_v1, %v747_v55 }
 0x645   :  { %787 = vadd.xlane.f32.xlu1 %v786_v56 }
 0x646   :  { %v769_v59 = vsel %vm83_vm0, %v3727_v57, 0.0  ;;  %v3734_v27 = vadd.f32 %v3286_v25, %v757_v58  ;;  %v781_v29 = vmul.f32 %v3727_v57, %v3727_v57 }
 0x647   :  { %770 = vadd.xlane.f32.xlu0 %v769_v59 }
 0x648   :  { %v772_v28 = vsel %vm83_vm0, %v3734_v27, 0.0  ;;  %v782_v31 = vmul.f32 %v3734_v27, %v3734_v27  ;;  %v789_v30 = vsel %vm83_vm0, %v781_v29, 0.0  ;;  %v2586_v29 = vld [vmem:[%s4356_s8] ss:$0 sm:$0xff] }
 0x649   :  { %773 = vadd.xlane.f32.xlu1 %v772_v28 }
 0x64a   :  { %v792_v32 = vsel %vm83_vm0, %v782_v31, 0.0 }
 0x64b   :  { %790 = vadd.xlane.f32.xlu0 %v789_v30 }
 0x64d   :  { %793 = vadd.xlane.f32.xlu1 %v792_v32 }
 0x6cc   :  { %v765_v9 = vpop.xlane.xlu0 %764 }
 0x6cd   :  { %v775_v10 = vmul.f32 0.015625, %v765_v9  ;;  %v3090_v9 = vld [vmem:[%s4359_s11 + $0x18] sm:$0xff]  }
 0x6ce   :  { %v768_v11 = vpop.xlane.xlu1 %767  ;;  %2779 = vmatpush3.bf16.msra.mxu1 %v3090_v9 }
 0x6cf   :  { %v776_v12 = vmul.f32 0.015625, %v768_v11  ;;  %v799_v0 = vmul.f32 %v775_v10, %v775_v10  ;;  %v807_v56 = vsub.f32 %v3705_v22, %v775_v10  ;;  %v3091_v10 = vld [vmem:[%s4359_s11 + $0x60] sm:$0xff]  }
 0x6d0   :  { %v785_v13 = vpop.xlane.xlu0 %784  ;;  %v3092_v11 = vld [vmem:[%s4359_s11 + $0x20] sm:$0xff]   ;;  %2780 = vmatprep.subr.bf16.mxu1 %v3091_v10 }
 0x6d1   :  { %v795_v14 = vmul.f32 0.015625, %v785_v13  ;;  %v800_v15 = vmul.f32 %v776_v12, %v776_v12  ;;  %v808_v58 = vsub.f32 %v3713_v39, %v776_v12  ;;  %v3093_v12 = vld [vmem:[%s4359_s11 + $0x68] sm:$0xff]  }
 0x6d2   :  { %v788_v1 = vpop.xlane.xlu1 %787  ;;  %2781 = vmatpush3.bf16.msra.mxu1 %v3092_v11  ;;  %v3094_v13 = vld [vmem:[%s4359_s11 + $0x28] sm:$0xff]  }
 0x6d3   :  { %v803_v16 = vsub.f32 %v795_v14, %v799_v0  ;;  %v796_v17 = vmul.f32 0.015625, %v788_v1  ;;  %2782 = vmatprep.subr.bf16.mxu1 %v3093_v12  ;;  %v3095_v0 = vld [vmem:[%s4359_s11 + $0x70] sm:$0xff]   ;;  %v3097_v1 = vld [vmem:[%s4359_s11 + $0x78] sm:$0xff]  }
 0x6d4   :  { %v771_v19 = vpop.xlane.xlu0 %770  ;;  %v3096_v14 = vld [vmem:[%s4359_s11 + $0x30] sm:$0xff]  }
 0x6d5   :  { %v811_v2 = vadd.f32 1e-05, %v803_v16  ;;  %v804_v6 = vsub.f32 %v796_v17, %v800_v15  ;;  %v777_v37 = vmul.f32 0.015625, %v771_v19  ;;  %v3098_v15 = vld [vmem:[%s4359_s11 + $0x38] sm:$0xff]   ;;  %v845_v16 = vlaneseq }
 0x6d6   :  { %v774_v21 = vpop.xlane.xlu1 %773  ;;  %2783 = vmatpush3.bf16.msra.mxu1 %v3094_v13 }
 0x6d7   :  { %3179 = vrsqrt.f32 %v811_v2  ;;  %v812_v38 = vadd.f32 1e-05, %v804_v6  ;;  %v778_v34 = vmul.f32 0.015625, %v774_v21  ;;  %v801_v43 = vmul.f32 %v777_v37, %v777_v37  ;;  %2784 = vmatprep.subr.bf16.mxu1 %v3095_v0  ;;  %v843_v2 = vld [vmem:[%s4358_s10] sm:$0x3] }
 0x6d8   :  { %v791_v41 = vpop.xlane.xlu0 %790  ;;  %v809_v32 = vsub.f32 %v3727_v57, %v777_v37  ;;  %v3828_v17 = vshrl.u32 %v845_v16, 7 }
 0x6d9   :  { %3181 = vrsqrt.f32 %v812_v38  ;;  %v797_v46 = vmul.f32 0.015625, %v791_v41  ;;  %v802_v42 = vmul.f32 %v778_v34, %v778_v34  ;;  %v810_v44 = vsub.f32 %v3734_v27, %v778_v34 }
 0x6da   :  { %v794_v49 = vpop.xlane.xlu1 %793  ;;  %2785 = vmatpush3.bf16.msra.mxu1 %v3096_v14  ;;  %v847_v19 = vsub.s32 0, %v3828_v17  ;;  %v851_v6 = vsub.s32 1, %v3828_v17 }
 0x6db   :  { %v805_v50 = vsub.f32 %v797_v46, %v801_v43  ;;  %v798_v51 = vmul.f32 0.015625, %v794_v49  ;;  %2786 = vmatprep.subr.bf16.mxu1 %v3097_v1 }
 0x6dc   :  { %v848_v37 = vrot.slane %v843_v2, %v847_v19  ;;  %v852_v21 = vrot.slane %v843_v2, %v851_v6 }
 0x6dd   :  { %v813_v53 = vadd.f32 1e-05, %v805_v50  ;;  %v806_v54 = vsub.f32 %v798_v51, %v802_v42 }
 0x6de   :  { %2787 = vmatpush3.bf16.msra.mxu1 %v3098_v15 }
 0x6df   :  { %3183 = vrsqrt.f32 %v813_v53  ;;  %v814_v55 = vadd.f32 1e-05, %v806_v54  ;;  %2962 = vmatprep.subr.bf16.mxu1 %v3491_v26 }
 0x6e1   :  { %v3180_v45 = vpop.eup %3179  ;;  %3185 = vrsqrt.f32 %v814_v55 }
 0x6e2   :  { %v819_v59 = vmul.f32 %v3180_v45, %v807_v56 }
 0x6e3   :  { %v3182_v25 = vpop.eup %3181 }
 0x6e4   :  { %v820_v28 = vmul.f32 %v3182_v25, %v808_v58  ;;  %v829_v31 = vmul.f32 %v2586_v29, %v819_v59 }
 0x6e6   :  { %v830_v30 = vmul.f32 %v2586_v29, %v820_v28 }
 0x6e8   :  { %v841_v33 = vpack.c.bf16 %v830_v30, %v829_v31 }
 0x6e9   :  { %v3184_v35 = vpop.eup %3183 }
 0x6ea   :  { %2595 = vmatmul.mubr.msk.bf16.vlgmr.msra.gmra.mrb[8].mxu0 %vm83_vm0, %v841_v33  ;;  %v821_v60 = vmul.f32 %v3184_v35, %v809_v32 }
 0x6eb   :  { %v3186_v61 = vpop.eup %3185  ;;  %943 = vmatprep.mubr.bf16.mxu0 %v3323_v24 }
 0x6ec   :  { %v822_v62 = vmul.f32 %v3186_v61, %v810_v44  ;;  %v831_v63 = vmul.f32 %v2586_v29, %v821_v60 }
 0x6ee   :  { %v832_v3 = vmul.f32 %v2586_v29, %v822_v62 }
 0x6f0   :  { %v842_v4 = vpack.c.bf16 %v832_v3, %v831_v63 }
 0x6f2   :  { %2596 = vmatmul.mubr.msk.bf16.gmra.mrb[12].mxu0 %vm83_vm0, %v842_v4 }
 0x6f3   :  { %1419 = vmatprep.mubr.bf16.mxu0 %v3323_v24 }
 0x7bd   :  { %v935_v38 = vpop.f32.mrb[8].mxu0 }
 0x7be   :  { %v936_v34 = vadd.f32 %v935_v38, %v848_v37  ;;  %v937_v26 = vpop.f32.mrb[9].mxu0 }
 0x7bf   :  { %v938_v41 = vadd.f32 %v937_v26, %v852_v21  ;;  %v939_v43 = vpop.f32.mrb[10].mxu0 }
 0x7c0   :  { %v963_v46 = vmul.f32 0.70710677, %v936_v34  ;;  %v940_v49 = vadd.f32 %v939_v43, %v848_v37  ;;  %v941_v42 = vpop.f32.mrb[11].mxu0  ;;  %v954_v3 = vmul.f32 0.5, %v936_v34 }
 0x7c1   :  { %v964_v50 = vmul.f32 0.70710677, %v938_v41  ;;  %v942_v51 = vadd.f32 %v941_v42, %v852_v21  ;;  %v955_v7 = vmul.f32 0.5, %v938_v41 }
 0x7c2   :  { %3187 = verf.f32 %v963_v46  ;;  %v965_v53 = vmul.f32 0.70710677, %v940_v49  ;;  %v956_v4 = vmul.f32 0.5, %v940_v49  ;;  %v3842_v49 = vld [vmem:[%s4350_s2] sm:$0xff]  }
 0x7c3   :  { %3189 = verf.f32 %v964_v50  ;;  %v966_v54 = vmul.f32 0.70710677, %v942_v51  ;;  %v957_v8 = vmul.f32 0.5, %v942_v51  ;;  %v3848_v51 = vld [vmem:[%s4350_s2 + $0x8] sm:$0xff]  }
 0x7c4   :  { %3191 = verf.f32 %v965_v53 }
 0x7c5   :  { %3193 = verf.f32 %v966_v54  ;;  %v945_v55 = vpop.f32.mrb[12].mxu0 }
 0x7c6   :  { %v946_v56 = vadd.f32 %v945_v55, %v848_v37  ;;  %v947_v45 = vpop.f32.mrb[13].mxu0 }
 0x7c7   :  { %v948_v58 = vadd.f32 %v947_v45, %v852_v21  ;;  %v949_v59 = vpop.f32.mrb[14].mxu0  ;;  %v3855_v45 = vld [vmem:[%s4350_s2 + $0x10] sm:$0xff]  }
 0x7c8   :  { %v967_v25 = vmul.f32 0.70710677, %v946_v56  ;;  %v950_v29 = vadd.f32 %v949_v59, %v848_v37  ;;  %v951_v28 = vpop.f32.mrb[15].mxu0  ;;  %v958_v38 = vmul.f32 0.5, %v946_v56  ;;  %v3869_v59 = vld [vmem:[%s4350_s2 + $0x20] sm:$0xff]  }
 0x7c9   :  { %v968_v31 = vmul.f32 0.70710677, %v948_v58  ;;  %v952_v30 = vadd.f32 %v951_v28, %v852_v21  ;;  %v959_v41 = vmul.f32 0.5, %v948_v58  ;;  %v3862_v58 = vld [vmem:[%s4350_s2 + $0x18] sm:$0xff]  }
 0x7ca   :  { %3195 = verf.f32 %v967_v25  ;;  %v969_v32 = vmul.f32 0.70710677, %v950_v29  ;;  %v960_v34 = vmul.f32 0.5, %v950_v29  ;;  %v3876_v25 = vld [vmem:[%s4350_s2 + $0x28] sm:$0xff]   ;;  %v3883_v29 = vld [vmem:[%s4350_s2 + $0x30] sm:$0xff]   ;;  %v3890_v28 = vld [vmem:[%s4350_s2 + $0x38] sm:$0xff]  }
 0x7cb   :  { %3197 = verf.f32 %v968_v31  ;;  %v970_v33 = vmul.f32 0.70710677, %v952_v30  ;;  %v961_v43 = vmul.f32 0.5, %v952_v30  ;;  %v2597_v30 = vld [vmem:[%s4360_s12] ss:$0 sm:$0xff] }
 0x7cc   :  { %v3188_v35 = vpop.eup %3187  ;;  %3199 = verf.f32 %v969_v32 }
 0x7cd   :  { %v3190_v44 = vpop.eup %3189  ;;  %v979_v60 = vadd.f32 1.0, %v3188_v35  ;;  %3201 = verf.f32 %v970_v33 }
 0x7ce   :  { %v3192_v61 = vpop.eup %3191  ;;  %v980_v62 = vadd.f32 1.0, %v3190_v44 }
 0x7cf   :  { %v3194_v63 = vpop.eup %3193  ;;  %v981_v5 = vadd.f32 1.0, %v3192_v61  ;;  %v987_v10 = vmul.f32 %v979_v60, %v954_v3 }
 0x7d0   :  { %v982_v9 = vadd.f32 1.0, %v3194_v63  ;;  %v988_v12 = vmul.f32 %v980_v62, %v955_v7 }
 0x7d1   :  { %v989_v11 = vmul.f32 %v981_v5, %v956_v4 }
 0x7d2   :  { %v990_v13 = vmul.f32 %v982_v9, %v957_v8 }
 0x7d3   :  { %v1027_v0 = vpack.c.bf16 %v989_v11, %v987_v10 }
 0x7d4   :  { %v3196_v14 = vpop.eup %3195  ;;  %v1028_v1 = vpack.c.bf16 %v990_v13, %v988_v12 }
 0x7d5   :  { %v3198_v15 = vpop.eup %3197  ;;  %v983_v16 = vadd.f32 1.0, %v3196_v14 }
 0x7d6   :  { %v3200_v2 = vpop.eup %3199  ;;  %v984_v37 = vadd.f32 1.0, %v3198_v15  ;;  %1166 = vmatprep.mubr.bf16.mxu1 %v1028_v1 }
 0x7d7   :  { %v3202_v21 = vpop.eup %3201  ;;  %v985_v26 = vadd.f32 1.0, %v3200_v2  ;;  %1167 = vmatmul.mubr.bf16.vlgmr.msra.gmra.mrb[16].mxu1 %v1027_v0  ;;  %v991_v42 = vmul.f32 %v983_v16, %v958_v38 }
 0x7d8   :  { %v986_v46 = vadd.f32 1.0, %v3202_v21  ;;  %2963 = vmatpush3.bf16.msra.mxu1 %v3842_v49  ;;  %v992_v53 = vmul.f32 %v984_v37, %v959_v41 }
 0x7d9   :  { %v993_v50 = vmul.f32 %v985_v26, %v960_v34  ;;  %2964 = vmatprep.subr.bf16.mxu1 %v3848_v51 }
 0x7da   :  { %v994_v54 = vmul.f32 %v986_v46, %v961_v43 }
 0x7db   :  { %v1029_v55 = vpack.c.bf16 %v993_v50, %v991_v42 }
 0x7dc   :  { %v1030_v56 = vpack.c.bf16 %v994_v54, %v992_v53  ;;  %2965 = vmatpush3.bf16.msra.mxu1 %v3848_v51 }
 0x7dd   :  { %2966 = vmatprep.subr.bf16.mxu1 %v3855_v45 }
 0x7de   :  { %1174 = vmatprep.mubr.bf16.mxu1 %v1030_v56 }
 0x7df   :  { %1175 = vmatmul.mubr.bf16.gmra.mrb[20].mxu1 %v1029_v55 }
 0x7e0   :  { %2967 = vmatpush3.bf16.msra.mxu1 %v3855_v45 }
 0x7e1   :  { %2968 = vmatprep.subr.bf16.mxu1 %v3862_v58 }
 0x7e4   :  { %2969 = vmatpush3.bf16.msra.mxu1 %v3862_v58 }
 0x7e5   :  { %2970 = vmatprep.subr.bf16.mxu1 %v3869_v59 }
 0x7e8   :  { %2971 = vmatpush3.bf16.msra.mxu1 %v3869_v59 }
 0x7e9   :  { %2972 = vmatprep.subr.bf16.mxu1 %v3876_v25 }
 0x7ec   :  { %2973 = vmatpush3.bf16.msra.mxu1 %v3876_v25 }
 0x7ed   :  { %2974 = vmatprep.subr.bf16.mxu1 %v3883_v29 }
 0x7f0   :  { %2975 = vmatpush3.bf16.msra.mxu1 %v3883_v29 }
 0x7f1   :  { %2976 = vmatprep.subr.bf16.mxu1 %v3890_v28 }
 0x7f4   :  { %2977 = vmatpush3.bf16.msra.mxu1 %v3890_v28 }
 0x8aa   :  { %v2788_v31 = vpop.f32.mrb[16].mxu1 }
 0x8ab   :  { %v2789_v32 = vpop.f32.mrb[17].mxu1 }
 0x8ac   :  { %v2790_v33 = vadd.f32 %v2789_v32, %v2788_v31  ;;  %v2791_v35 = vpop.f32.mrb[18].mxu1 }
 0x8ad   :  { %v2792_v44 = vpop.f32.mrb[19].mxu1 }
 0x8ae   :  { %v3897_v60 = vadd.f32 %v2790_v33, %v2597_v30  ;;  %v2793_v61 = vadd.f32 %v2792_v44, %v2791_v35 }
 0x8b0   :  { %v3899_v62 = vadd.f32 %v2793_v61, %v2597_v30  ;;  %v1184_v63 = vsel %vm83_vm0, %v3897_v60, 0.0  ;;  %v1200_v3 = vmul.f32 %v3897_v60, %v3897_v60 }
 0x8b1   :  { %1185 = vadd.xlane.f32.xlu0 %v1184_v63 }
 0x8b2   :  { %v2794_v4 = vpop.f32.mrb[20].mxu1  ;;  %v1187_v5 = vsel %vm83_vm0, %v3899_v62, 0.0  ;;  %v1201_v7 = vmul.f32 %v3899_v62, %v3899_v62  ;;  %v1204_v11 = vsel %vm83_vm0, %v1200_v3, 0.0 }
 0x8b3   :  { %1188 = vadd.xlane.f32.xlu1 %v1187_v5  ;;  %v2795_v8 = vpop.f32.mrb[21].mxu1 }
 0x8b4   :  { %v2796_v9 = vadd.f32 %v2795_v8, %v2794_v4  ;;  %v2797_v10 = vpop.f32.mrb[22].mxu1  ;;  %v1207_v14 = vsel %vm83_vm0, %v1201_v7, 0.0 }
 0x8b5   :  { %1205 = vadd.xlane.f32.xlu0 %v1204_v11  ;;  %v2798_v12 = vpop.f32.mrb[23].mxu1 }
 0x8b6   :  { %v3910_v13 = vadd.f32 %v2796_v9, %v2597_v30  ;;  %v2799_v0 = vadd.f32 %v2798_v12, %v2797_v10 }
 0x8b7   :  { %1208 = vadd.xlane.f32.xlu1 %v1207_v14 }
 0x8b8   :  { %v3913_v1 = vadd.f32 %v2799_v0, %v2597_v30  ;;  %v1190_v15 = vsel %vm83_vm0, %v3910_v13, 0.0  ;;  %v1202_v16 = vmul.f32 %v3910_v13, %v3910_v13 }
 0x8b9   :  { %1191 = vadd.xlane.f32.xlu0 %v1190_v15  ;;  %v2614_v15 = vld [vmem:[%s4361_s13] ss:$0 sm:$0xff] }
 0x8ba   :  { %v1193_v2 = vsel %vm83_vm0, %v3913_v1, 0.0  ;;  %v1203_v37 = vmul.f32 %v3913_v1, %v3913_v1  ;;  %v1210_v21 = vsel %vm83_vm0, %v1202_v16, 0.0 }
 0x8bb   :  { %1194 = vadd.xlane.f32.xlu1 %v1193_v2 }
 0x8bc   :  { %v1213_v38 = vsel %vm83_vm0, %v1203_v37, 0.0 }
 0x8bd   :  { %1211 = vadd.xlane.f32.xlu0 %v1210_v21 }
 0x8bf   :  { %1214 = vadd.xlane.f32.xlu1 %v1213_v38 }
 0x93e   :  { %v1186_v34 = vpop.xlane.xlu0 %1185 }
 0x93f   :  { %v1196_v26 = vmul.f32 0.015625, %v1186_v34 }
 0x940   :  { %v1189_v41 = vpop.xlane.xlu1 %1188 }
 0x941   :  { %v1197_v43 = vmul.f32 0.015625, %v1189_v41  ;;  %v1220_v42 = vmul.f32 %v1196_v26, %v1196_v26  ;;  %v1228_v0 = vsub.f32 %v3897_v60, %v1196_v26 }
 0x942   :  { %v1206_v46 = vpop.xlane.xlu0 %1205 }
 0x943   :  { %v1216_v50 = vmul.f32 0.015625, %v1206_v46  ;;  %v1221_v54 = vmul.f32 %v1197_v43, %v1197_v43  ;;  %v1229_v16 = vsub.f32 %v3899_v62, %v1197_v43 }
 0x944   :  { %v1209_v53 = vpop.xlane.xlu1 %1208 }
 0x945   :  { %v1224_v55 = vsub.f32 %v1216_v50, %v1220_v42  ;;  %v1217_v56 = vmul.f32 0.015625, %v1209_v53 }
 0x946   :  { %v1192_v31 = vpop.xlane.xlu0 %1191 }
 0x947   :  { %v1232_v30 = vadd.f32 1e-05, %v1224_v55  ;;  %v1225_v32 = vsub.f32 %v1217_v56, %v1221_v54  ;;  %v1198_v33 = vmul.f32 0.015625, %v1192_v31 }
 0x948   :  { %v1195_v35 = vpop.xlane.xlu1 %1194 }
 0x949   :  { %3203 = vrsqrt.f32 %v1232_v30  ;;  %v1233_v44 = vadd.f32 1e-05, %v1225_v32  ;;  %v1199_v61 = vmul.f32 0.015625, %v1195_v35  ;;  %v1222_v3 = vmul.f32 %v1198_v33, %v1198_v33 }
 0x94a   :  { %v1212_v63 = vpop.xlane.xlu0 %1211  ;;  %v1230_v46 = vsub.f32 %v3910_v13, %v1198_v33 }
 0x94b   :  { %3205 = vrsqrt.f32 %v1233_v44  ;;  %v1218_v4 = vmul.f32 0.015625, %v1212_v63  ;;  %v1223_v7 = vmul.f32 %v1199_v61, %v1199_v61  ;;  %v1231_v43 = vsub.f32 %v3913_v1, %v1199_v61  ;;  %v3099_v63 = vld [vmem:[%s4352_s4 + $0x40] ss:$8 sps:$4 sm:$0xff]  }
 0x94c   :  { %v1215_v5 = vpop.xlane.xlu1 %1214 }
 0x94d   :  { %v1226_v8 = vsub.f32 %v1218_v4, %v1222_v3  ;;  %v1219_v9 = vmul.f32 0.015625, %v1215_v5  ;;  %v3104_v3 = vld [vmem:[%s4352_s4 + $0x54] ss:$8 sps:$4 sm:$0xff]   ;;  %v3102_v4 = vld [vmem:[%s4352_s4 + $0x50] ss:$8 sps:$4 sm:$0xff]  }
 0x94e   :  { %v3107_v5 = vld [vmem:[%s4352_s4 + $0x64] ss:$8 sps:$4 sm:$0xff]  }
 0x94f   :  { %v1234_v10 = vadd.f32 1e-05, %v1226_v8  ;;  %v1227_v11 = vsub.f32 %v1219_v9, %v1223_v7  ;;  %v3105_v7 = vld [vmem:[%s4352_s4 + $0x60] ss:$8 sps:$4 sm:$0xff]   ;;  %v3110_v8 = vld [vmem:[%s4352_s4 + $0x74] ss:$8 sps:$4 sm:$0xff]  }
 0x950   :  { %v3108_v9 = vld [vmem:[%s4352_s4 + $0x70] ss:$8 sps:$4 sm:$0xff]  }
 0x951   :  { %3207 = vrsqrt.f32 %v1234_v10  ;;  %v1235_v12 = vadd.f32 1e-05, %v1227_v11 }
 0x953   :  { %v3204_v14 = vpop.eup %3203  ;;  %3209 = vrsqrt.f32 %v1235_v12 }
 0x954   :  { %v1240_v2 = vmul.f32 %v3204_v14, %v1228_v0 }
 0x955   :  { %v3206_v37 = vpop.eup %3205 }
 0x956   :  { %v1250_v21 = vmul.f32 %v2614_v15, %v1240_v2  ;;  %v1241_v38 = vmul.f32 %v3206_v37, %v1229_v16 }
 0x958   :  { %v3931_v34 = vadd.f32 %v1250_v21, %v3705_v22  ;;  %v1251_v41 = vmul.f32 %v2614_v15, %v1241_v38 }
 0x95a   :  { %v1260_v60 = vsel %vm83_vm0, %v3931_v34, 0.0  ;;  %v3937_v26 = vadd.f32 %v1251_v41, %v3713_v39  ;;  %v1276_v42 = vmul.f32 %v3931_v34, %v3931_v34 }
 0x95b   :  { %v3208_v62 = vpop.eup %3207  ;;  %1261 = vadd.xlane.f32.xlu0 %v1260_v60 }
 0x95c   :  { %v1263_v22 = vsel %vm83_vm0, %v3937_v26, 0.0  ;;  %v1277_v50 = vmul.f32 %v3937_v26, %v3937_v26  ;;  %v1242_v13 = vmul.f32 %v3208_v62, %v1230_v46  ;;  %v1280_v54 = vsel %vm83_vm0, %v1276_v42, 0.0 }
 0x95d   :  { %v3210_v53 = vpop.eup %3209  ;;  %1264 = vadd.xlane.f32.xlu1 %v1263_v22 }
 0x95e   :  { %v1252_v39 = vmul.f32 %v2614_v15, %v1242_v13  ;;  %v1243_v55 = vmul.f32 %v3210_v53, %v1231_v43  ;;  %v1283_v56 = vsel %vm83_vm0, %v1277_v50, 0.0 }
 0x95f   :  { %1281 = vadd.xlane.f32.xlu0 %v1280_v54 }
 0x960   :  { %v3949_v31 = vadd.f32 %v1252_v39, %v3727_v57  ;;  %v1253_v1 = vmul.f32 %v2614_v15, %v1243_v55 }
 0x961   :  { %1284 = vadd.xlane.f32.xlu1 %v1283_v56 }
 0x962   :  { %v1266_v30 = vsel %vm83_vm0, %v3949_v31, 0.0  ;;  %v3954_v32 = vadd.f32 %v1253_v1, %v3734_v27  ;;  %v1278_v33 = vmul.f32 %v3949_v31, %v3949_v31  ;;  %v3101_v27 = vld [vmem:[%s4352_s4 + $0x44] ss:$8 sps:$4 sm:$0xff]  }
 0x963   :  { %1267 = vadd.xlane.f32.xlu0 %v1266_v30  ;;  %1387 = vmatprep.subr.bf16.mxu0 %v3101_v27 }
 0x964   :  { %v1269_v35 = vsel %vm83_vm0, %v3954_v32, 0.0  ;;  %v1279_v44 = vmul.f32 %v3954_v32, %v3954_v32  ;;  %v1286_v57 = vsel %vm83_vm0, %v1278_v33, 0.0  ;;  %1388 = vmatpush1.bf16.msra.mxu0 %v3099_v63  ;;  %v2616_v63 = vld [vmem:[%s4351_s3 + $0x1] ss:$0 sm:$0xff] }
 0x965   :  { %1270 = vadd.xlane.f32.xlu1 %v1269_v35  ;;  %1389 = vmatprep.subr.bf16.mxu0 %v3104_v3 }
 0x966   :  { %v1289_v61 = vsel %vm83_vm0, %v1279_v44, 0.0 }
 0x967   :  { %1287 = vadd.xlane.f32.xlu0 %v1286_v57 }
 0x968   :  { %1390 = vmatpush1.bf16.msra.mxu0 %v3102_v4 }
 0x969   :  { %1290 = vadd.xlane.f32.xlu1 %v1289_v61  ;;  %1391 = vmatprep.subr.bf16.mxu0 %v3107_v5 }
 0x96c   :  { %1392 = vmatpush1.bf16.msra.mxu0 %v3105_v7 }
 0x96d   :  { %1393 = vmatprep.subr.bf16.mxu0 %v3110_v8 }
 0x970   :  { %1394 = vmatpush1.bf16.msra.mxu0 %v3108_v9 }
 0x9e8   :  { %v1262_v10 = vpop.xlane.xlu0 %1261 }
 0x9e9   :  { %v1272_v11 = vmul.f32 0.015625, %v1262_v10 }
 0x9ea   :  { %v1265_v12 = vpop.xlane.xlu1 %1264 }
 0x9eb   :  { %v1273_v0 = vmul.f32 0.015625, %v1265_v12  ;;  %v1296_v15 = vmul.f32 %v1272_v11, %v1272_v11  ;;  %v1304_v35 = vsub.f32 %v3931_v34, %v1272_v11 }
 0x9ec   :  { %v1282_v14 = vpop.xlane.xlu0 %1281 }
 0x9ed   :  { %v1292_v16 = vmul.f32 0.015625, %v1282_v14  ;;  %v1297_v37 = vmul.f32 %v1273_v0, %v1273_v0  ;;  %v1305_v57 = vsub.f32 %v3937_v26, %v1273_v0 }
 0x9ee   :  { %v1285_v2 = vpop.xlane.xlu1 %1284 }
 0x9ef   :  { %v1300_v21 = vsub.f32 %v1292_v16, %v1296_v15  ;;  %v1293_v38 = vmul.f32 0.015625, %v1285_v2 }
 0x9f0   :  { %v1268_v41 = vpop.xlane.xlu0 %1267 }
 0x9f1   :  { %v1308_v46 = vadd.f32 1e-05, %v1300_v21  ;;  %v1301_v60 = vsub.f32 %v1293_v38, %v1297_v37  ;;  %v1274_v42 = vmul.f32 0.015625, %v1268_v41 }
 0x9f2   :  { %v1271_v62 = vpop.xlane.xlu1 %1270 }
 0x9f3   :  { %3211 = vrsqrt.f32 %v1308_v46  ;;  %v1309_v43 = vadd.f32 1e-05, %v1301_v60  ;;  %v1275_v22 = vmul.f32 0.015625, %v1271_v62  ;;  %v1298_v13 = vmul.f32 %v1274_v42, %v1274_v42 }
 0x9f4   :  { %v1288_v50 = vpop.xlane.xlu0 %1287  ;;  %v1306_v7 = vsub.f32 %v3949_v31, %v1274_v42 }
 0x9f5   :  { %3213 = vrsqrt.f32 %v1309_v43  ;;  %v1294_v53 = vmul.f32 0.015625, %v1288_v50  ;;  %v1299_v39 = vmul.f32 %v1275_v22, %v1275_v22  ;;  %v1307_v10 = vsub.f32 %v3954_v32, %v1275_v22 }
 0x9f6   :  { %v1291_v54 = vpop.xlane.xlu1 %1290 }
 0x9f7   :  { %v1302_v55 = vsub.f32 %v1294_v53, %v1298_v13  ;;  %v1295_v56 = vmul.f32 0.015625, %v1291_v54 }
 0x9f9   :  { %v1310_v1 = vadd.f32 1e-05, %v1302_v55  ;;  %v1303_v30 = vsub.f32 %v1295_v56, %v1299_v39 }
 0x9fb   :  { %3215 = vrsqrt.f32 %v1310_v1  ;;  %v1311_v33 = vadd.f32 1e-05, %v1303_v30 }
 0x9fd   :  { %v3212_v44 = vpop.eup %3211  ;;  %3217 = vrsqrt.f32 %v1311_v33 }
 0x9fe   :  { %v1316_v61 = vmul.f32 %v3212_v44, %v1304_v35 }
 0x9ff   :  { %v3214_v27 = vpop.eup %3213 }
 0xa00   :  { %v1317_v3 = vmul.f32 %v3214_v27, %v1305_v57  ;;  %v1326_v4 = vmul.f32 %v2616_v63, %v1316_v61 }
 0xa02   :  { %v1327_v5 = vmul.f32 %v2616_v63, %v1317_v3 }
 0xa04   :  { %v1339_v8 = vpack.c.bf16 %v1327_v5, %v1326_v4 }
 0xa05   :  { %v3216_v9 = vpop.eup %3215 }
 0xa06   :  { %2633 = vmatmul.mubr.msk.bf16.vlgmr.msra.gmra.mrb[16].mxu0 %vm83_vm0, %v1339_v8  ;;  %v1318_v11 = vmul.f32 %v3216_v9, %v1306_v7  ;;  %v3295_v7 = vld [vmem:[%s4371_s29] sm:$0xff] }
 0xa07   :  { %v3218_v12 = vpop.eup %3217  ;;  %1429 = vmatprep.mubr.bf16.mxu0 %v3323_v24 }
 0xa08   :  { %v1319_v0 = vmul.f32 %v3218_v12, %v1307_v10  ;;  %v1328_v14 = vmul.f32 %v2616_v63, %v1318_v11  ;;  %v3296_v11 = vld [vmem:[%s4371_s29 + $0x8] sm:$0xff] }
 0xa0a   :  { %v1329_v15 = vmul.f32 %v2616_v63, %v1319_v0  ;;  %v3297_v0 = vld [vmem:[%s4371_s29 + $0x10] sm:$0xff] }
 0xa0c   :  { %v1340_v16 = vpack.c.bf16 %v1329_v15, %v1328_v14  ;;  %v3298_v15 = vld [vmem:[%s4371_s29 + $0x18] sm:$0xff] }
 0xa0e   :  { %2634 = vmatmul.mubr.msk.bf16.gmra.mrb[20].mxu0 %vm83_vm0, %v1340_v16 }
 0xad9   :  { %v1421_v2 = vpop.f32.mrb[16].mxu0 }
 0xada   :  { %v1423_v37 = vpop.f32.mrb[17].mxu0 }
 0xadb   :  { %v1425_v21 = vpop.f32.mrb[18].mxu0 }
 0xadc   :  { %v1440_v38 = vpack.c.bf16 %v1425_v21, %v1421_v2  ;;  %v1427_v41 = vpop.f32.mrb[19].mxu0 }
 0xadd   :  { %v3998_v46 = vpack.c.bf16 %v1427_v41, %v1423_v37 }
 0xade   :  { %2958 = vmatprep.mubr.msk.bf16.mxu0 %vm83_vm0, %v1440_v38  ;;  %v1444_v60 = vmul.bf16 %v1440_v38, %v3567_v20  ;;  %v1448_v22 = vmul.bf16 %v1440_v38, %v3580_v36  ;;  %v1450_v20 = vmul.bf16 %v1440_v38, %v3591_v47  ;;  %v1446_v39 = vmul.bf16 %v1440_v38, %v3569_v23 }
 0xadf   :  { %v4004_v42 = vmul.bf16 %v3842_v49, %v3998_v46 }
 0xae0   :  { %1468 = vrot.lane.b32.xlu0 %v1444_v60, %s3324_s24 }
 0xae1   :  { %v1431_v62 = vpop.f32.mrb[20].mxu0  ;;  %2982 = vmatprep.subr.bf16.mxu1 %v4004_v42 }
 0xae2   :  { %v1433_v43 = vpop.f32.mrb[21].mxu0 }
 0xae3   :  { %v1435_v50 = vpop.f32.mrb[22].mxu0 }
 0xae4   :  { %v1441_v13 = vpack.c.bf16 %v1435_v50, %v1431_v62  ;;  %1476 = vrot.lane.b32.xlu0 %v1448_v22, %s3324_s24  ;;  %v1437_v53 = vpop.f32.mrb[23].mxu0 }
 0xae5   :  { %v4010_v54 = vpack.c.bf16 %v1437_v53, %v1433_v43 }
 0xae6   :  { %v1445_v49 = vmul.bf16 %v1441_v13, %v3565_v18  ;;  %v1447_v36 = vmul.bf16 %v1441_v13, %v3584_v40  ;;  %v1449_v55 = vmul.bf16 %v1441_v13, %v3595_v48  ;;  %v1451_v47 = vmul.bf16 %v1441_v13, %v3602_v52 }
 0xae8   :  { %1480 = vrot.lane.b32.xlu0 %v1450_v20, %s3324_s24  ;;  %1470 = vrot.lane.b32.xlu1 %v1445_v49, %s3324_s24 }
 0xaec   :  { %1472 = vrot.lane.b32.xlu1 %v1446_v39, %s3324_s24 }
 0xaf0   :  { %1474 = vrot.lane.b32.xlu1 %v1447_v36, %s3324_s24 }
 0xaf4   :  { %1478 = vrot.lane.b32.xlu1 %v1449_v55, %s3324_s24 }
 0xaf8   :  { %1482 = vrot.lane.b32.xlu1 %v1451_v47, %s3324_s24 }
 0xb52   :  { %v1469_v18 = vpop.permute.xlu0 %1468 }
 0xb53   :  { %v1491_v56 = vsel %vm83_vm0, %v1469_v18, 0  ;;  %3034 = vmatprep.subr.msk.bf16.mxu0 %vm83_vm0, %v1469_v18  ;;  %v1453_v18 = vmul.bf16 %v3848_v51, %v4010_v54  ;;  %v1457_v51 = vmul.bf16 %v3876_v25, %v4010_v54  ;;  %v3112_v25 = vld [vmem:[%s4353_s5 + $0x28] sm:$0xff]  }
 0xb54   :  { %2943 = vmatpush3.bf16.xpose.msra.mxu0 %v1491_v56  ;;  %v1454_v56 = vmul.bf16 %v3855_v45, %v3998_v46  ;;  %v1458_v45 = vmul.bf16 %v3883_v29, %v3998_v46  ;;  %v3113_v29 = vld [vmem:[%s4353_s5 + $0x30] sm:$0xff]  }
 0xb56   :  { %v1477_v33 = vpop.permute.xlu0 %1476 }
 0xb57   :  { %v1503_v35 = vsel %vm83_vm0, %v1477_v33, 0 }
 0xb5a   :  { %v1471_v23 = vpop.permute.xlu1 %1470  ;;  %v1481_v61 = vpop.permute.xlu0 %1480 }
 0xb5b   :  { %v1494_v1 = vsel %vm83_vm0, %v1471_v23, 0  ;;  %3035 = vmatprep.subr.msk.bf16.mxu0 %vm83_vm0, %v1471_v23  ;;  %v1509_v27 = vsel %vm83_vm0, %v1481_v61, 0  ;;  %v1455_v23 = vmul.bf16 %v3862_v58, %v4010_v54  ;;  %v1459_v58 = vmul.bf16 %v3890_v28, %v4010_v54  ;;  %v3114_v28 = vld [vmem:[%s4353_s5 + $0x38] sm:$0xff]  }
 0xb5c   :  { %2945 = vmatpush3.bf16.xpose.msra.mxu0 %v1494_v1  ;;  %v1456_v1 = vmul.bf16 %v3869_v59, %v3998_v46  ;;  %v3111_v59 = vld [vmem:[%s4353_s5 + $0x20] sm:$0xff]   ;;  %s2546_s5 = sshll.u32 %s3325_s23, 4  ;;  %s2547_s5 = int_to_ptr.vmem [resolvable:$true] %s2546_s5 }
 0xb5d   :  { %s3299_s4 = scalar_lea.vmem %s2547_s5, 512  ;;  %p3304_p1 = scmp.lt.s32.totalorder %s2547_s5, %s2547_s5 }
 0xb5e   :  { %v1473_v40 = vpop.permute.xlu1 %1472  ;;  %p3300_p0 = scmp.ne.s32.totalorder %s2547_s5, %s3299_s4  ;;  %p3305_p2 = scmp.lt.s32.totalorder %s3299_s4, %s3299_s4 }
 0xb5f   :  { %3036 = vmatprep.subr.msk.bf16.mxu0 %vm83_vm0, %v1473_v40  ;;  %v1497_v48 = vsel %vm83_vm0, %v1473_v40, 0 }
 0xb60   :  { %p3306_p3 = por %p3305_p2, %p3304_p1 }
 0xb62   :  { %v1475_v52 = vpop.permute.xlu1 %1474  ;;  %p3307_p4 = pnand %p3306_p3, %p3300_p0 }
 0xb63   :  { %v1500_v30 = vsel %vm83_vm0, %v1475_v52, 0 }
 0xb64   :  { %2947 = vmatpush3.bf16.xpose.msra.mxu0 %v1497_v48 }
 0xb65   :  { %3037 = vmatprep.subr.msk.bf16.mxu0 %vm83_vm0, %v1475_v52 }
 0xb66   :  { %v1479_v44 = vpop.permute.xlu1 %1478 }
 0xb67   :  { %v1506_v57 = vsel %vm83_vm0, %v1479_v44, 0 }
 0xb6a   :  { %v1483_v63 = vpop.permute.xlu1 %1482 }
 0xb6b   :  { %v1512_v3 = vsel %vm83_vm0, %v1483_v63, 0 }
 0xb6c   :  { %2949 = vmatpush3.bf16.xpose.msra.mxu0 %v1500_v30 }
 0xb6d   :  { %3038 = vmatprep.subr.msk.bf16.mxu0 %vm83_vm0, %v1477_v33 }
 0xb74   :  { %2951 = vmatpush3.bf16.xpose.msra.mxu0 %v1503_v35 }
 0xb75   :  { %3039 = vmatprep.subr.msk.bf16.mxu0 %vm83_vm0, %v1479_v44 }
 0xb7c   :  { %2953 = vmatpush3.bf16.xpose.msra.mxu0 %v1506_v57 }
 0xb7d   :  { %3040 = vmatprep.subr.msk.bf16.mxu0 %vm83_vm0, %v1481_v61 }
 0xb84   :  { %2955 = vmatpush3.bf16.xpose.msra.mxu0 %v1509_v27 }
 0xb85   :  { %3041 = vmatprep.subr.msk.bf16.mxu0 %vm83_vm0, %v1483_v63 }
 0xb8c   :  { %2957 = vmatpush3.bf16.xpose.msra.mxu0 %v1512_v3 }
 0xb8d   :  { %3002 = vmatprep.subr.bf16.mxu0 %v3111_v59 }
 0xb93   :  { %2959 = vmatmul.mubr.msk.bf16.vlgmr.msra.gmra.mrb[24].mxu0 %vm83_vm0, %v1441_v13 }
 0xb94   :  { %3003 = vmatpush3.bf16.msra.mxu0 %v3111_v59 }
 0xb95   :  { %3004 = vmatprep.subr.bf16.mxu0 %v3112_v25 }
 0xb98   :  { %3005 = vmatpush3.bf16.msra.mxu0 %v3112_v25 }
 0xb99   :  { %3006 = vmatprep.subr.bf16.mxu0 %v3113_v29 }
 0xb9c   :  { %3007 = vmatpush3.bf16.msra.mxu0 %v3113_v29 }
 0xb9d   :  { %3008 = vmatprep.subr.bf16.mxu0 %v3114_v28 }
 0xba0   :  { %3009 = vmatpush3.bf16.msra.mxu0 %v3114_v28 }
 0xc66   :  { %v2960_v4 = vpop.f32.mrb[24].mxu0 }
 0xc67   :  { %v1548_v5 = vpop.f32.mrb[25].mxu0  ;;  %v1557_v14 = vadd.f32 %v3297_v0, %v2960_v4 }
 0xc68   :  { %v1549_v8 = vadd.f32 %v3295_v7, %v1548_v5  ;;  %v2961_v9 = vpop.f32.mrb[26].mxu0 }
 0xc69   :  { %v1551_v10 = vpop.f32.mrb[27].mxu0  ;;  %v1560_v16 = vadd.f32 %v3298_v15, %v2961_v9 }
 0xc6a   :  { %v1552_v12 = vadd.f32 %v3296_v11, %v1551_v10  ;;  %1563 = vmax.xlane.f32.xlu0 %v1549_v8 }
 0xc6c   :  { %1565 = vmax.xlane.f32.xlu1 %v1552_v12 }
 0xc6e   :  { %1567 = vmax.xlane.f32.xlu0 %v1557_v14 }
 0xc72   :  { %1569 = vmax.xlane.f32.xlu0 %v1560_v16 }
 0xcf7   :  { %v1564_v2 = vpop.xlane.xlu0 %1563 }
 0xcf8   :  { %v1571_v37 = vsub.f32 %v1549_v8, %v1564_v2 }
 0xcf9   :  { %v1566_v21 = vpop.xlane.xlu1 %1565 }
 0xcfa   :  { %v1575_v38 = vmul.f32 1.442695, %v1571_v37  ;;  %v1572_v41 = vsub.f32 %v1552_v12, %v1566_v21  ;;  %v2646_v12 = vld [vmem:[%s4354_s6 + $0x1] ss:$0 sm:$0xff] }
 0xcfb   :  { %v1568_v60 = vpop.xlane.xlu0 %1567 }
 0xcfc   :  { %v1577_v62 = vmul.f32 1.442695, %v1572_v41  ;;  %v1573_v43 = vsub.f32 %v1557_v14, %v1568_v60  ;;  %3219 = vpow2.f32 %v1575_v38 }
 0xcfe   :  { %3221 = vpow2.f32 %v1577_v62  ;;  %v1579_v22 = vmul.f32 1.442695, %v1573_v43 }
 0xcff   :  { %v1570_v50 = vpop.xlane.xlu0 %1569 }
 0xd00   :  { %v1574_v13 = vsub.f32 %v1560_v16, %v1570_v50  ;;  %3223 = vpow2.f32 %v1579_v22 }
 0xd02   :  { %v1581_v53 = vmul.f32 1.442695, %v1574_v13 }
 0xd04   :  { %3225 = vpow2.f32 %v1581_v53 }
 0xd06   :  { %v3220_v20 = vpop.eup %3219 }
 0xd08   :  { %v3222_v49 = vpop.eup %3221 }
 0xd09   :  { %v1583_v39 = vpack.c.bf16 %v3222_v49, %v3220_v20 }
 0xd0a   :  { %v3224_v36 = vpop.eup %3223 }
 0xd0b   :  { %2978 = vmatprep.mubr.bf16.mxu1 %v1583_v39 }
 0xd0e   :  { %v3226_v55 = vpop.eup %3225 }
 0xd0f   :  { %v1584_v47 = vpack.c.bf16 %v3226_v55, %v3224_v36 }
 0xd11   :  { %2979 = vmatmul.mubr.bf16.vlgmr.msra.gmra.mrb[24].mxu1 %v1584_v47 }
 0xd12   :  { %2983 = vmatpush3.bf16.msra.mxu1 %v4004_v42  ;;  %2998 = vmatprep.mubr.bf16.mxu1 %v1583_v39 }
 0xd13   :  { %2984 = vmatprep.subr.bf16.mxu1 %v1453_v18 }
 0xd16   :  { %2985 = vmatpush3.bf16.msra.mxu1 %v1453_v18 }
 0xd17   :  { %2986 = vmatprep.subr.bf16.mxu1 %v1454_v56 }
 0xd1a   :  { %2987 = vmatpush3.bf16.msra.mxu1 %v1454_v56 }
 0xd1b   :  { %2988 = vmatprep.subr.bf16.mxu1 %v1455_v23 }
 0xd1e   :  { %2989 = vmatpush3.bf16.msra.mxu1 %v1455_v23 }
 0xd1f   :  { %2990 = vmatprep.subr.bf16.mxu1 %v1456_v1 }
 0xd22   :  { %2991 = vmatpush3.bf16.msra.mxu1 %v1456_v1 }
 0xd23   :  { %2992 = vmatprep.subr.bf16.mxu1 %v1457_v51 }
 0xd26   :  { %2993 = vmatpush3.bf16.msra.mxu1 %v1457_v51 }
 0xd27   :  { %2994 = vmatprep.subr.bf16.mxu1 %v1458_v45 }
 0xd2a   :  { %2995 = vmatpush3.bf16.msra.mxu1 %v1458_v45 }
 0xd2b   :  { %2996 = vmatprep.subr.bf16.mxu1 %v1459_v58 }
 0xd2e   :  { %2997 = vmatpush3.bf16.msra.mxu1 %v1459_v58 }
 0xd31   :  { %2999 = vmatmul.mubr.bf16.vlgmr.msra.gmra.mrb[28].mxu1 %v1584_v47 }
 0xd32   :  { %2043 = vmatprep.mubr.bf16.mxu1 %v3323_v24 }
 0xde4   :  { %v2980_v46 = vpop.f32.mrb[24].mxu1 }
 0xde5   :  { %v1619_v42 = vpop.f32.mrb[25].mxu1  ;;  %v1685_v48 = vmax.f32 %v2980_v46, 1e-20 }
 0xde6   :  { %v2981_v54 = vpop.f32.mrb[26].mxu1  ;;  %v1683_v52 = vmax.f32 %v1619_v42, 1e-20 }
 0xde7   :  { %v1622_v40 = vpop.f32.mrb[27].mxu1  ;;  %v1686_v30 = vmax.f32 %v2981_v54, 1e-20  ;;  %3227 = vrcp.f32 %v1685_v48 }
 0xde8   :  { %v1684_v33 = vmax.f32 %v1622_v40, 1e-20  ;;  %3229 = vrcp.f32 %v1683_v52 }
 0xde9   :  { %3231 = vrcp.f32 %v1686_v30 }
 0xdea   :  { %3233 = vrcp.f32 %v1684_v33 }
 0xdf1   :  { %v3228_v35 = vpop.eup %3227 }
 0xdf2   :  { %v3230_v57 = vpop.eup %3229 }
 0xdf3   :  { %v3232_v63 = vpop.eup %3231 }
 0xdf4   :  { %v3234_v5 = vpop.eup %3233 }
 0xe04   :  { %v3000_v44 = vpop.f32.mrb[28].mxu1 }
 0xe05   :  { %v1693_v61 = vmul.f32 %v3228_v35, %v3000_v44  ;;  %v1668_v27 = vpop.f32.mrb[29].mxu1 }
 0xe06   :  { %v1691_v3 = vmul.f32 %v3230_v57, %v1668_v27  ;;  %v3001_v4 = vpop.f32.mrb[30].mxu1 }
 0xe07   :  { %v1694_v7 = vmul.f32 %v3232_v63, %v3001_v4  ;;  %v1671_v8 = vpop.f32.mrb[31].mxu1 }
 0xe08   :  { %v1692_v9 = vmul.f32 %v3234_v5, %v1671_v8 }
 0xe09   :  { %v1705_v10 = vpack.c.bf16 %v1694_v7, %v1693_v61  ;;  %v2654_v7 = vld [vmem:[%s4355_s7 + $0x1] ss:$0 sm:$0xff] }
 0xe0a   :  { %v1704_v11 = vpack.c.bf16 %v1692_v9, %v1691_v3 }
 0xe0c   :  { %3010 = vmatprep.mubr.msk.bf16.mxu0 %vm83_vm0, %v1704_v11 }
 0xe0d   :  { %3011 = vmatmul.mubr.msk.bf16.vlgmr.msra.gmra.mrb[28].mxu0 %vm83_vm0, %v1705_v10 }
 0xee0   :  { %v3012_v0 = vpop.f32.mrb[28].mxu0 }
 0xee1   :  { %v1778_v14 = vpop.f32.mrb[29].mxu0  ;;  %v4098_v62 = vadd.f32 %v3012_v0, %v2646_v12 }
 0xee2   :  { %v4086_v15 = vadd.f32 %v2646_v12, %v1778_v14  ;;  %v3013_v16 = vpop.f32.mrb[30].mxu0 }
 0xee3   :  { %v1781_v2 = vpop.f32.mrb[31].mxu0  ;;  %v4101_v22 = vadd.f32 %v3013_v16, %v2646_v12  ;;  %v1801_v13 = vsel %vm83_vm0, %v4098_v62, 0.0  ;;  %v1813_v53 = vmul.f32 %v4098_v62, %v4098_v62 }
 0xee4   :  { %v4088_v37 = vadd.f32 %v2646_v12, %v1781_v2  ;;  %v1795_v21 = vsel %vm83_vm0, %v4086_v15, 0.0  ;;  %v1811_v38 = vmul.f32 %v4086_v15, %v4086_v15 }
 0xee5   :  { %1796 = vadd.xlane.f32.xlu0 %v1795_v21  ;;  %v1804_v20 = vsel %vm83_vm0, %v4101_v22, 0.0  ;;  %v1814_v49 = vmul.f32 %v4101_v22, %v4101_v22  ;;  %v1821_v39 = vsel %vm83_vm0, %v1813_v53, 0.0 }
 0xee6   :  { %v1798_v41 = vsel %vm83_vm0, %v4088_v37, 0.0  ;;  %v1812_v60 = vmul.f32 %v4088_v37, %v4088_v37  ;;  %v1815_v43 = vsel %vm83_vm0, %v1811_v38, 0.0 }
 0xee7   :  { %1799 = vadd.xlane.f32.xlu1 %v1798_v41  ;;  %v1824_v36 = vsel %vm83_vm0, %v1814_v49, 0.0 }
 0xee8   :  { %v1818_v50 = vsel %vm83_vm0, %v1812_v60, 0.0 }
 0xee9   :  { %1816 = vadd.xlane.f32.xlu0 %v1815_v43 }
 0xeeb   :  { %1819 = vadd.xlane.f32.xlu1 %v1818_v50 }
 0xeed   :  { %1802 = vadd.xlane.f32.xlu0 %v1801_v13 }
 0xeef   :  { %1805 = vadd.xlane.f32.xlu1 %v1804_v20 }
 0xef1   :  { %1822 = vadd.xlane.f32.xlu0 %v1821_v39 }
 0xef3   :  { %1825 = vadd.xlane.f32.xlu1 %v1824_v36 }
 0xf72   :  { %v1797_v55 = vpop.xlane.xlu0 %1796 }
 0xf73   :  { %v1807_v47 = vmul.f32 0.015625, %v1797_v55 }
 0xf74   :  { %v1800_v18 = vpop.xlane.xlu1 %1799 }
 0xf75   :  { %v1808_v56 = vmul.f32 0.015625, %v1800_v18  ;;  %v1831_v1 = vmul.f32 %v1807_v47, %v1807_v47  ;;  %v1839_v4 = vsub.f32 %v4086_v15, %v1807_v47  ;;  %v3115_v18 = vld [vmem:[%s4357_s9 + $0x40] ss:$8 sps:$4 sm:$0xff]  }
 0xf76   :  { %v1817_v23 = vpop.xlane.xlu0 %1816 }
 0xf77   :  { %v1827_v51 = vmul.f32 0.015625, %v1817_v23  ;;  %v1832_v58 = vmul.f32 %v1808_v56, %v1808_v56  ;;  %v1840_v8 = vsub.f32 %v4088_v37, %v1808_v56  ;;  %v3120_v56 = vld [vmem:[%s4357_s9 + $0x54] ss:$8 sps:$4 sm:$0xff]   ;;  %v3118_v23 = vld [vmem:[%s4357_s9 + $0x50] ss:$8 sps:$4 sm:$0xff]  }
 0xf78   :  { %v1820_v45 = vpop.xlane.xlu1 %1819 }
 0xf79   :  { %v1835_v59 = vsub.f32 %v1827_v51, %v1831_v1  ;;  %v1828_v25 = vmul.f32 0.015625, %v1820_v45  ;;  %v3123_v1 = vld [vmem:[%s4357_s9 + $0x64] ss:$8 sps:$4 sm:$0xff]   ;;  %v3121_v51 = vld [vmem:[%s4357_s9 + $0x60] ss:$8 sps:$4 sm:$0xff]  }
 0xf7a   :  { %v1803_v29 = vpop.xlane.xlu0 %1802  ;;  %v3124_v45 = vld [vmem:[%s4357_s9 + $0x70] ss:$8 sps:$4 sm:$0xff]  }
 0xf7b   :  { %v1843_v28 = vadd.f32 1e-05, %v1835_v59  ;;  %v1836_v46 = vsub.f32 %v1828_v25, %v1832_v58  ;;  %v1809_v42 = vmul.f32 0.015625, %v1803_v29  ;;  %v3126_v58 = vld [vmem:[%s4357_s9 + $0x74] ss:$8 sps:$4 sm:$0xff]   ;;  %v3127_v59 = vld [vmem:[%s4359_s11 + $0xc0] sm:$0xff]  }
 0xf7c   :  { %v1806_v54 = vpop.xlane.xlu1 %1805  ;;  %v3128_v25 = vld [vmem:[%s4359_s11 + $0x80] sm:$0xff]   ;;  %v3129_v29 = vld [vmem:[%s4359_s11 + $0xc8] sm:$0xff]   ;;  %2836 = vmatprep.subr.bf16.mxu0 %v3127_v59 }
 0xf7d   :  { %3235 = vrsqrt.f32 %v1843_v28  ;;  %v1844_v40 = vadd.f32 1e-05, %v1836_v46  ;;  %v1810_v48 = vmul.f32 0.015625, %v1806_v54  ;;  %v1833_v30 = vmul.f32 %v1809_v42, %v1809_v42  ;;  %2837 = vmatpush3.bf16.msra.mxu0 %v3128_v25  ;;  %v3130_v28 = vld [vmem:[%s4359_s11 + $0x88] sm:$0xff]  }
 0xf7e   :  { %v1823_v52 = vpop.xlane.xlu0 %1822  ;;  %v1841_v16 = vsub.f32 %v4098_v62, %v1809_v42  ;;  %2838 = vmatprep.subr.bf16.mxu0 %v3129_v29  ;;  %v3137_v59 = vld [vmem:[%s4359_s11 + $0xe8] sm:$0xff]   ;;  %v3139_v29 = vld [vmem:[%s4359_s11 + $0xf0] sm:$0xff]  }
 0xf7f   :  { %3237 = vrsqrt.f32 %v1844_v40  ;;  %v1829_v33 = vmul.f32 0.015625, %v1823_v52  ;;  %v1834_v44 = vmul.f32 %v1810_v48, %v1810_v48  ;;  %v1842_v38 = vsub.f32 %v4101_v22, %v1810_v48  ;;  %v3138_v25 = vld [vmem:[%s4359_s11 + $0xa8] sm:$0xff]  }
 0xf80   :  { %v1826_v35 = vpop.xlane.xlu1 %1825 }
 0xf81   :  { %v1837_v57 = vsub.f32 %v1829_v33, %v1833_v30  ;;  %v1830_v61 = vmul.f32 0.015625, %v1826_v35  ;;  %2839 = vmatpush3.bf16.msra.mxu0 %v3130_v28  ;;  %v3140_v28 = vld [vmem:[%s4359_s11 + $0xb0] sm:$0xff]  }
 0xf83   :  { %v1845_v27 = vadd.f32 1e-05, %v1837_v57  ;;  %v1838_v63 = vsub.f32 %v1830_v61, %v1834_v44 }
 0xf85   :  { %3239 = vrsqrt.f32 %v1845_v27  ;;  %v1846_v3 = vadd.f32 1e-05, %v1838_v63 }
 0xf87   :  { %v3236_v5 = vpop.eup %3235  ;;  %3241 = vrsqrt.f32 %v1846_v3 }
 0xf88   :  { %v1851_v9 = vmul.f32 %v3236_v5, %v1839_v4 }
 0xf89   :  { %v3238_v10 = vpop.eup %3237 }
 0xf8a   :  { %v1861_v11 = vmul.f32 %v2654_v7, %v1851_v9  ;;  %v1852_v12 = vmul.f32 %v3238_v10, %v1840_v8 }
 0xf8c   :  { %v4120_v0 = vadd.f32 %v1861_v11, %v3931_v34  ;;  %v1862_v14 = vmul.f32 %v2654_v7, %v1852_v12 }
 0xf8e   :  { %v1871_v15 = vsel %vm83_vm0, %v4120_v0, 0.0  ;;  %v4126_v2 = vadd.f32 %v1862_v14, %v3937_v26  ;;  %v1887_v21 = vmul.f32 %v4120_v0, %v4120_v0 }
 0xf8f   :  { %v3240_v37 = vpop.eup %3239  ;;  %1872 = vadd.xlane.f32.xlu0 %v1871_v15 }
 0xf90   :  { %v1874_v34 = vsel %vm83_vm0, %v4126_v2, 0.0  ;;  %v1888_v41 = vmul.f32 %v4126_v2, %v4126_v2  ;;  %v1853_v60 = vmul.f32 %v3240_v37, %v1841_v16  ;;  %v1891_v43 = vsel %vm83_vm0, %v1887_v21, 0.0 }
 0xf91   :  { %v3242_v62 = vpop.eup %3241  ;;  %1875 = vadd.xlane.f32.xlu1 %v1874_v34 }
 0xf92   :  { %v1863_v26 = vmul.f32 %v2654_v7, %v1853_v60  ;;  %v1854_v50 = vmul.f32 %v3242_v62, %v1842_v38  ;;  %v1894_v13 = vsel %vm83_vm0, %v1888_v41, 0.0 }
 0xf93   :  { %1892 = vadd.xlane.f32.xlu0 %v1891_v43  ;;  %v2656_v43 = vld [vmem:[%s4356_s8 + $0x1] ss:$0 sm:$0xff] }
 0xf94   :  { %v4138_v53 = vadd.f32 %v1863_v26, %v3949_v31  ;;  %v1864_v22 = vmul.f32 %v2654_v7, %v1854_v50 }
 0xf95   :  { %1895 = vadd.xlane.f32.xlu1 %v1894_v13 }
 0xf96   :  { %v1877_v20 = vsel %vm83_vm0, %v4138_v53, 0.0  ;;  %v4143_v49 = vadd.f32 %v1864_v22, %v3954_v32  ;;  %v1889_v39 = vmul.f32 %v4138_v53, %v4138_v53  ;;  %v3117_v32 = vld [vmem:[%s4357_s9 + $0x44] ss:$8 sps:$4 sm:$0xff]  }
 0xf97   :  { %1878 = vadd.xlane.f32.xlu0 %v1877_v20  ;;  %2011 = vmatprep.subr.bf16.mxu1 %v3117_v32 }
 0xf98   :  { %v1880_v36 = vsel %vm83_vm0, %v4143_v49, 0.0  ;;  %v1890_v55 = vmul.f32 %v4143_v49, %v4143_v49  ;;  %v1897_v31 = vsel %vm83_vm0, %v1889_v39, 0.0  ;;  %2012 = vmatpush1.bf16.msra.mxu1 %v3115_v18 }
 0xf99   :  { %1881 = vadd.xlane.f32.xlu1 %v1880_v36  ;;  %2013 = vmatprep.subr.bf16.mxu1 %v3120_v56 }
 0xf9a   :  { %v1900_v47 = vsel %vm83_vm0, %v1890_v55, 0.0 }
 0xf9b   :  { %1898 = vadd.xlane.f32.xlu0 %v1897_v31 }
 0xf9c   :  { %2014 = vmatpush1.bf16.msra.mxu1 %v3118_v23  ;;  %v3131_v23 = vld [vmem:[%s4359_s11 + $0xd0] sm:$0xff]  }
 0xf9d   :  { %1901 = vadd.xlane.f32.xlu1 %v1900_v47  ;;  %2015 = vmatprep.subr.bf16.mxu1 %v3123_v1  ;;  %v3132_v1 = vld [vmem:[%s4359_s11 + $0x90] sm:$0xff]  }
 0xf9e   :  { %2840 = vmatprep.subr.bf16.mxu0 %v3131_v23 }
 0xf9f   :  { %2841 = vmatpush3.bf16.msra.mxu0 %v3132_v1 }
 0xfa0   :  { %2016 = vmatpush1.bf16.msra.mxu1 %v3121_v51  ;;  %v3134_v51 = vld [vmem:[%s4359_s11 + $0x98] sm:$0xff]  }
 0xfa1   :  { %2017 = vmatprep.subr.bf16.mxu1 %v3126_v58  ;;  %v3136_v58 = vld [vmem:[%s4359_s11 + $0xa0] sm:$0xff]  }
 0xfa4   :  { %2018 = vmatpush1.bf16.msra.mxu1 %v3124_v45  ;;  %v3135_v45 = vld [vmem:[%s4359_s11 + $0xe0] sm:$0xff]  }
0x101c   :  { %v1873_v46 = vpop.xlane.xlu0 %1872 }
0x101d   :  { %v1883_v42 = vmul.f32 0.015625, %v1873_v46  ;;  %v3141_v46 = vld [vmem:[%s4359_s11 + $0xf8] sm:$0xff]  }
0x101e   :  { %v1876_v54 = vpop.xlane.xlu1 %1875 }
0x101f   :  { %v1884_v40 = vmul.f32 0.015625, %v1876_v54  ;;  %v1907_v52 = vmul.f32 %v1883_v42, %v1883_v42  ;;  %v1915_v38 = vsub.f32 %v4120_v0, %v1883_v42  ;;  %v3142_v42 = vld [vmem:[%s4359_s11 + $0xb8] sm:$0xff]   ;;  %v2665_v54 = vld [vmem:[%s4358_s10 + $0x2] sm:$0x3] }
0x1020   :  { %v1893_v48 = vpop.xlane.xlu0 %1892 }
0x1021   :  { %v1903_v30 = vmul.f32 0.015625, %v1893_v48  ;;  %v1908_v35 = vmul.f32 %v1884_v40, %v1884_v40  ;;  %v1916_v41 = vsub.f32 %v4126_v2, %v1884_v40  ;;  %v1958_v40 = vrot.slane %v2665_v54, %v847_v19 }
0x1022   :  { %v1896_v33 = vpop.xlane.xlu1 %1895  ;;  %v1962_v48 = vrot.slane %v2665_v54, %v851_v6 }
0x1023   :  { %v1911_v44 = vsub.f32 %v1903_v30, %v1907_v52  ;;  %v1904_v57 = vmul.f32 0.015625, %v1896_v33 }
0x1024   :  { %v1879_v61 = vpop.xlane.xlu0 %1878 }
0x1025   :  { %v1919_v27 = vadd.f32 1e-05, %v1911_v44  ;;  %v1912_v63 = vsub.f32 %v1904_v57, %v1908_v35  ;;  %v1885_v3 = vmul.f32 0.015625, %v1879_v61 }
0x1026   :  { %v1882_v4 = vpop.xlane.xlu1 %1881 }
0x1027   :  { %3243 = vrsqrt.f32 %v1919_v27  ;;  %v1920_v5 = vadd.f32 1e-05, %v1912_v63  ;;  %v1886_v7 = vmul.f32 0.015625, %v1882_v4  ;;  %v1909_v9 = vmul.f32 %v1885_v3, %v1885_v3 }
0x1028   :  { %v1899_v8 = vpop.xlane.xlu0 %1898  ;;  %v1917_v22 = vsub.f32 %v4138_v53, %v1885_v3 }
0x1029   :  { %3245 = vrsqrt.f32 %v1920_v5  ;;  %v1905_v10 = vmul.f32 0.015625, %v1899_v8  ;;  %v1910_v12 = vmul.f32 %v1886_v7, %v1886_v7  ;;  %v1918_v36 = vsub.f32 %v4143_v49, %v1886_v7 }
0x102a   :  { %v1902_v11 = vpop.xlane.xlu1 %1901 }
0x102b   :  { %v1913_v14 = vsub.f32 %v1905_v10, %v1909_v9  ;;  %v1906_v16 = vmul.f32 0.015625, %v1902_v11 }
0x102d   :  { %v1921_v15 = vadd.f32 1e-05, %v1913_v14  ;;  %v1914_v21 = vsub.f32 %v1906_v16, %v1910_v12 }
0x102f   :  { %3247 = vrsqrt.f32 %v1921_v15  ;;  %v1922_v37 = vadd.f32 1e-05, %v1914_v21 }
0x1031   :  { %v3244_v34 = vpop.eup %3243  ;;  %3249 = vrsqrt.f32 %v1922_v37 }
0x1032   :  { %v1927_v60 = vmul.f32 %v3244_v34, %v1915_v38 }
0x1033   :  { %v3246_v62 = vpop.eup %3245 }
0x1034   :  { %v1928_v26 = vmul.f32 %v3246_v62, %v1916_v41  ;;  %v1937_v50 = vmul.f32 %v2656_v43, %v1927_v60 }
0x1036   :  { %v1938_v13 = vmul.f32 %v2656_v43, %v1928_v26 }
0x1038   :  { %v1950_v20 = vpack.c.bf16 %v1938_v13, %v1937_v50 }
0x1039   :  { %v3248_v39 = vpop.eup %3247 }
0x103a   :  { %2674 = vmatmul.mubr.msk.bf16.vlgmr.msra.gmra.mrb[32].mxu1 %vm83_vm0, %v1950_v20  ;;  %v1929_v55 = vmul.f32 %v3248_v39, %v1917_v22 }
0x103b   :  { %v3250_v31 = vpop.eup %3249  ;;  %2053 = vmatprep.mubr.bf16.mxu1 %v3323_v24  ;;  %v3133_v24 = vld [vmem:[%s4359_s11 + $0xd8] sm:$0xff]  }
0x103c   :  { %v1930_v47 = vmul.f32 %v3250_v31, %v1918_v36  ;;  %v1939_v32 = vmul.f32 %v2656_v43, %v1929_v55  ;;  %2842 = vmatprep.subr.bf16.mxu0 %v3133_v24 }
0x103d   :  { %2843 = vmatpush3.bf16.msra.mxu0 %v3134_v51 }
0x103e   :  { %v1940_v18 = vmul.f32 %v2656_v43, %v1930_v47  ;;  %2844 = vmatprep.subr.bf16.mxu0 %v3135_v45 }
0x1040   :  { %v1951_v56 = vpack.c.bf16 %v1940_v18, %v1939_v32 }
0x1041   :  { %2845 = vmatpush3.bf16.msra.mxu0 %v3136_v58 }
0x1042   :  { %2675 = vmatmul.mubr.msk.bf16.gmra.mrb[36].mxu1 %vm83_vm0, %v1951_v56  ;;  %2846 = vmatprep.subr.bf16.mxu0 %v3137_v59 }
0x1045   :  { %2847 = vmatpush3.bf16.msra.mxu0 %v3138_v25 }
0x1046   :  { %2848 = vmatprep.subr.bf16.mxu0 %v3139_v29 }
0x1049   :  { %2849 = vmatpush3.bf16.msra.mxu0 %v3140_v28 }
0x104a   :  { %2850 = vmatprep.subr.bf16.mxu0 %v3141_v46 }
0x104d   :  { %2851 = vmatpush3.bf16.msra.mxu0 %v3142_v42 }
0x110d   :  { %v2045_v52 = vpop.f32.mrb[32].mxu1 }
0x110e   :  { %v2046_v30 = vadd.f32 %v2045_v52, %v1958_v40  ;;  %v2047_v33 = vpop.f32.mrb[33].mxu1 }
0x110f   :  { %v2048_v35 = vadd.f32 %v2047_v33, %v1962_v48  ;;  %v2049_v44 = vpop.f32.mrb[34].mxu1 }
0x1110   :  { %v2072_v57 = vmul.f32 0.70710677, %v2046_v30  ;;  %v2050_v61 = vadd.f32 %v2049_v44, %v1958_v40  ;;  %v2051_v27 = vpop.f32.mrb[35].mxu1  ;;  %v2064_v62 = vmul.f32 0.5, %v2046_v30  ;;  %v2709_v30 = vld [vmem:[%s4360_s12 + $0x1] ss:$0 sm:$0xff] }
0x1111   :  { %v2073_v63 = vmul.f32 0.70710677, %v2048_v35  ;;  %v2052_v3 = vadd.f32 %v2051_v27, %v1962_v48  ;;  %v2065_v50 = vmul.f32 0.5, %v2048_v35 }
0x1112   :  { %3251 = verf.f32 %v2072_v57  ;;  %v2074_v4 = vmul.f32 0.70710677, %v2050_v61  ;;  %v2066_v43 = vmul.f32 0.5, %v2050_v61 }
0x1113   :  { %3253 = verf.f32 %v2073_v63  ;;  %v2075_v5 = vmul.f32 0.70710677, %v2052_v3  ;;  %v2067_v13 = vmul.f32 0.5, %v2052_v3 }
0x1114   :  { %3255 = verf.f32 %v2074_v4 }
0x1115   :  { %3257 = verf.f32 %v2075_v5  ;;  %v2055_v19 = vpop.f32.mrb[36].mxu1 }
0x1116   :  { %v2056_v7 = vadd.f32 %v2055_v19, %v1958_v40  ;;  %v2057_v17 = vpop.f32.mrb[37].mxu1 }
0x1117   :  { %v2058_v6 = vadd.f32 %v2057_v17, %v1962_v48  ;;  %v2059_v8 = vpop.f32.mrb[38].mxu1 }
0x1118   :  { %v2076_v9 = vmul.f32 0.70710677, %v2056_v7  ;;  %v2060_v10 = vadd.f32 %v2059_v8, %v1958_v40  ;;  %v2061_v11 = vpop.f32.mrb[39].mxu1  ;;  %v2068_v51 = vmul.f32 0.5, %v2056_v7 }
0x1119   :  { %v2077_v12 = vmul.f32 0.70710677, %v2058_v6  ;;  %v2062_v14 = vadd.f32 %v2061_v11, %v1962_v48  ;;  %v2069_v59 = vmul.f32 0.5, %v2058_v6 }
0x111a   :  { %3259 = verf.f32 %v2076_v9  ;;  %v2078_v16 = vmul.f32 0.70710677, %v2060_v10  ;;  %v2070_v45 = vmul.f32 0.5, %v2060_v10 }
0x111b   :  { %3261 = verf.f32 %v2077_v12  ;;  %v2079_v15 = vmul.f32 0.70710677, %v2062_v14  ;;  %v2071_v25 = vmul.f32 0.5, %v2062_v14 }
0x111c   :  { %v3252_v21 = vpop.eup %3251  ;;  %3263 = verf.f32 %v2078_v16 }
0x111d   :  { %v3254_v37 = vpop.eup %3253  ;;  %v2088_v38 = vadd.f32 1.0, %v3252_v21  ;;  %3265 = verf.f32 %v2079_v15 }
0x111e   :  { %v3256_v34 = vpop.eup %3255  ;;  %v2089_v41 = vadd.f32 1.0, %v3254_v37 }
0x111f   :  { %v3258_v60 = vpop.eup %3257  ;;  %v2090_v26 = vadd.f32 1.0, %v3256_v34  ;;  %v2096_v20 = vmul.f32 %v2088_v38, %v2064_v62 }
0x1120   :  { %v2091_v22 = vadd.f32 1.0, %v3258_v60  ;;  %v2097_v36 = vmul.f32 %v2089_v41, %v2065_v50 }
0x1121   :  { %v2098_v39 = vmul.f32 %v2090_v26, %v2066_v43 }
0x1122   :  { %v2099_v55 = vmul.f32 %v2091_v22, %v2067_v13 }
0x1123   :  { %v2137_v31 = vpack.c.bf16 %v2098_v39, %v2096_v20 }
0x1124   :  { %v3260_v47 = vpop.eup %3259  ;;  %v2138_v32 = vpack.c.bf16 %v2099_v55, %v2097_v36 }
0x1125   :  { %v3262_v18 = vpop.eup %3261  ;;  %v2092_v56 = vadd.f32 1.0, %v3260_v47 }
0x1126   :  { %v3264_v23 = vpop.eup %3263  ;;  %v2093_v1 = vadd.f32 1.0, %v3262_v18  ;;  %2277 = vmatprep.mubr.bf16.mxu0 %v2138_v32 }
0x1127   :  { %v3266_v24 = vpop.eup %3265  ;;  %v2094_v58 = vadd.f32 1.0, %v3264_v23  ;;  %2278 = vmatmul.mubr.bf16.vlgmr.msra.gmra.mrb[32].mxu0 %v2137_v31  ;;  %v2100_v28 = vmul.f32 %v2092_v56, %v2068_v51 }
0x1128   :  { %v2095_v29 = vadd.f32 1.0, %v3266_v24  ;;  %v2101_v42 = vmul.f32 %v2093_v1, %v2069_v59 }
0x1129   :  { %v2102_v46 = vmul.f32 %v2094_v58, %v2070_v45 }
0x112a   :  { %v2103_v54 = vmul.f32 %v2095_v29, %v2071_v25 }
0x112b   :  { %v2139_v40 = vpack.c.bf16 %v2102_v46, %v2100_v28 }
0x112c   :  { %v2140_v48 = vpack.c.bf16 %v2103_v54, %v2101_v42 }
0x112e   :  { %2285 = vmatprep.mubr.bf16.mxu0 %v2140_v48  ;;  %v2727_v48 = vld [vmem:[%s4361_s13 + $0x1] ss:$0 sm:$0xff] }
0x112f   :  { %2286 = vmatmul.mubr.bf16.gmra.mrb[36].mxu0 %v2139_v40 }
0x11fa   :  { %v2852_v52 = vpop.f32.mrb[32].mxu0 }
0x11fb   :  { %v2853_v33 = vpop.f32.mrb[33].mxu0 }
0x11fc   :  { %v2854_v35 = vadd.f32 %v2853_v33, %v2852_v52  ;;  %v2855_v44 = vpop.f32.mrb[34].mxu0 }
0x11fd   :  { %v2856_v57 = vpop.f32.mrb[35].mxu0 }
0x11fe   :  { %v4245_v61 = vadd.f32 %v2854_v35, %v2709_v30  ;;  %v2857_v27 = vadd.f32 %v2856_v57, %v2855_v44 }
0x1200   :  { %v4247_v63 = vadd.f32 %v2857_v27, %v2709_v30  ;;  %v2296_v3 = vsel %vm83_vm0, %v4245_v61, 0.0  ;;  %v2312_v4 = vmul.f32 %v4245_v61, %v4245_v61 }
0x1201   :  { %2297 = vadd.xlane.f32.xlu0 %v2296_v3 }
0x1202   :  { %v2858_v5 = vpop.f32.mrb[36].mxu0  ;;  %v2299_v19 = vsel %vm83_vm0, %v4247_v63, 0.0  ;;  %v2313_v7 = vmul.f32 %v4247_v63, %v4247_v63  ;;  %v2316_v9 = vsel %vm83_vm0, %v2312_v4, 0.0 }
0x1203   :  { %2300 = vadd.xlane.f32.xlu1 %v2299_v19  ;;  %v2859_v17 = vpop.f32.mrb[37].mxu0 }
0x1204   :  { %v2860_v6 = vadd.f32 %v2859_v17, %v2858_v5  ;;  %v2861_v8 = vpop.f32.mrb[38].mxu0  ;;  %v2319_v14 = vsel %vm83_vm0, %v2313_v7, 0.0 }
0x1205   :  { %2317 = vadd.xlane.f32.xlu0 %v2316_v9  ;;  %v2862_v10 = vpop.f32.mrb[39].mxu0 }
0x1206   :  { %v4258_v11 = vadd.f32 %v2860_v6, %v2709_v30  ;;  %v2863_v12 = vadd.f32 %v2862_v10, %v2861_v8 }
0x1207   :  { %2320 = vadd.xlane.f32.xlu1 %v2319_v14 }
0x1208   :  { %v4261_v16 = vadd.f32 %v2863_v12, %v2709_v30  ;;  %v2302_v15 = vsel %vm83_vm0, %v4258_v11, 0.0  ;;  %v2314_v21 = vmul.f32 %v4258_v11, %v4258_v11 }
0x1209   :  { %2303 = vadd.xlane.f32.xlu0 %v2302_v15 }
0x120a   :  { %v2305_v37 = vsel %vm83_vm0, %v4261_v16, 0.0  ;;  %v2315_v38 = vmul.f32 %v4261_v16, %v4261_v16  ;;  %v2322_v34 = vsel %vm83_vm0, %v2314_v21, 0.0 }
0x120b   :  { %2306 = vadd.xlane.f32.xlu1 %v2305_v37 }
0x120c   :  { %v2325_v41 = vsel %vm83_vm0, %v2315_v38, 0.0 }
0x120d   :  { %2323 = vadd.xlane.f32.xlu0 %v2322_v34  ;;  %v3144_v34 = vld [vmem:[%s4363_s15 + $0x8] sm:$0xff]  }
0x120f   :  { %2326 = vadd.xlane.f32.xlu1 %v2325_v41  ;;  %v3145_v41 = vld [vmem:[%s4363_s15 + $0x10] sm:$0xff]  }
0x128e   :  { %v2298_v60 = vpop.xlane.xlu0 %2297 }
0x128f   :  { %v2308_v62 = vmul.f32 0.015625, %v2298_v60  ;;  %v3146_v60 = vld [vmem:[%s4363_s15 + $0x18] sm:$0xff]  }
0x1290   :  { %v2301_v43 = vpop.xlane.xlu1 %2300 }
0x1291   :  { %v2309_v26 = vmul.f32 0.015625, %v2301_v43  ;;  %v2332_v13 = vmul.f32 %v2308_v62, %v2308_v62  ;;  %v2340_v54 = vsub.f32 %v4245_v61, %v2308_v62 }
0x1292   :  { %v2318_v50 = vpop.xlane.xlu0 %2317 }
0x1293   :  { %v2328_v22 = vmul.f32 0.015625, %v2318_v50  ;;  %v2333_v39 = vmul.f32 %v2309_v26, %v2309_v26  ;;  %v2341_v52 = vsub.f32 %v4247_v63, %v2309_v26 }
0x1294   :  { %v2321_v20 = vpop.xlane.xlu1 %2320 }
0x1295   :  { %v2336_v36 = vsub.f32 %v2328_v22, %v2332_v13  ;;  %v2329_v55 = vmul.f32 0.015625, %v2321_v20 }
0x1296   :  { %v2304_v31 = vpop.xlane.xlu0 %2303 }
0x1297   :  { %v2344_v47 = vadd.f32 1e-05, %v2336_v36  ;;  %v2337_v32 = vsub.f32 %v2329_v55, %v2333_v39  ;;  %v2310_v18 = vmul.f32 0.015625, %v2304_v31 }
0x1298   :  { %v2307_v56 = vpop.xlane.xlu1 %2306 }
0x1299   :  { %3267 = vrsqrt.f32 %v2344_v47  ;;  %v2345_v23 = vadd.f32 1e-05, %v2337_v32  ;;  %v2311_v1 = vmul.f32 0.015625, %v2307_v56  ;;  %v2334_v51 = vmul.f32 %v2310_v18, %v2310_v18 }
0x129a   :  { %v2324_v24 = vpop.xlane.xlu0 %2323  ;;  %v2342_v3 = vsub.f32 %v4258_v11, %v2310_v18 }
0x129b   :  { %3269 = vrsqrt.f32 %v2345_v23  ;;  %v2330_v45 = vmul.f32 0.015625, %v2324_v24  ;;  %v2335_v59 = vmul.f32 %v2311_v1, %v2311_v1  ;;  %v2343_v19 = vsub.f32 %v4261_v16, %v2311_v1 }
0x129c   :  { %v2327_v58 = vpop.xlane.xlu1 %2326 }
0x129d   :  { %v2338_v25 = vsub.f32 %v2330_v45, %v2334_v51  ;;  %v2331_v29 = vmul.f32 0.015625, %v2327_v58 }
0x129f   :  { %v2346_v28 = vadd.f32 1e-05, %v2338_v25  ;;  %v2339_v46 = vsub.f32 %v2331_v29, %v2335_v59 }
0x12a1   :  { %3271 = vrsqrt.f32 %v2346_v28  ;;  %v2347_v42 = vadd.f32 1e-05, %v2339_v46 }
0x12a3   :  { %v3268_v40 = vpop.eup %3267  ;;  %3273 = vrsqrt.f32 %v2347_v42 }
0x12a4   :  { %v2352_v30 = vmul.f32 %v3268_v40, %v2340_v54 }
0x12a5   :  { %v3270_v33 = vpop.eup %3269 }
0x12a6   :  { %v2362_v35 = vmul.f32 %v2727_v48, %v2352_v30  ;;  %v2353_v44 = vmul.f32 %v3270_v33, %v2341_v52 }
0x12a8   :  { %v4279_v57 = vadd.f32 %v2362_v35, %v4120_v0  ;;  %v2363_v27 = vmul.f32 %v2727_v48, %v2353_v44  ;;  %v2728_v35 = vld [vmem:[%s4362_s14] ss:$0 sm:$0xff] }
0x12aa   :  { %v2371_v61 = vsel %vm83_vm0, %v4279_v57, 0.0  ;;  %v4285_v4 = vadd.f32 %v2363_v27, %v4126_v2  ;;  %v2387_v5 = vmul.f32 %v4279_v57, %v4279_v57 }
0x12ab   :  { %v3272_v63 = vpop.eup %3271  ;;  %2372 = vadd.xlane.f32.xlu0 %v2371_v61 }
0x12ac   :  { %v2374_v0 = vsel %vm83_vm0, %v4285_v4, 0.0  ;;  %v2388_v7 = vmul.f32 %v4285_v4, %v4285_v4  ;;  %v2354_v17 = vmul.f32 %v3272_v63, %v2342_v3  ;;  %v2391_v8 = vsel %vm83_vm0, %v2387_v5, 0.0 }
0x12ad   :  { %v3274_v6 = vpop.eup %3273  ;;  %2375 = vadd.xlane.f32.xlu1 %v2374_v0 }
0x12ae   :  { %v2364_v2 = vmul.f32 %v2727_v48, %v2354_v17  ;;  %v2355_v9 = vmul.f32 %v3274_v6, %v2343_v19  ;;  %v2394_v10 = vsel %vm83_vm0, %v2388_v7, 0.0 }
0x12af   :  { %2392 = vadd.xlane.f32.xlu0 %v2391_v8  ;;  %v2729_v8 = vld [vmem:[%s4364_s16] ss:$0 sm:$0xff] }
0x12b0   :  { %v4297_v11 = vadd.f32 %v2364_v2, %v4138_v53  ;;  %v2365_v12 = vmul.f32 %v2727_v48, %v2355_v9 }
0x12b1   :  { %2395 = vadd.xlane.f32.xlu1 %v2394_v10 }
0x12b2   :  { %v2377_v14 = vsel %vm83_vm0, %v4297_v11, 0.0  ;;  %v4302_v16 = vadd.f32 %v2365_v12, %v4143_v49  ;;  %v2389_v15 = vmul.f32 %v4297_v11, %v4297_v11  ;;  %v3143_v49 = vld [vmem:[%s4363_s15] sm:$0xff]  }
0x12b3   :  { %2378 = vadd.xlane.f32.xlu0 %v2377_v14  ;;  %3014 = vmatprep.subr.bf16.mxu1 %v3143_v49 }
0x12b4   :  { %v2380_v21 = vsel %vm83_vm0, %v4302_v16, 0.0  ;;  %v2390_v37 = vmul.f32 %v4302_v16, %v4302_v16  ;;  %v2397_v53 = vsel %vm83_vm0, %v2389_v15, 0.0  ;;  %3015 = vmatpush3.bf16.msra.mxu1 %v3143_v49 }
0x12b5   :  { %2381 = vadd.xlane.f32.xlu1 %v2380_v21  ;;  %3016 = vmatprep.subr.bf16.mxu1 %v3144_v34 }
0x12b6   :  { %v2400_v38 = vsel %vm83_vm0, %v2390_v37, 0.0 }
0x12b7   :  { %2398 = vadd.xlane.f32.xlu0 %v2397_v53 }
0x12b8   :  { %3017 = vmatpush3.bf16.msra.mxu1 %v3144_v34 }
0x12b9   :  { %2401 = vadd.xlane.f32.xlu1 %v2400_v38  ;;  %3018 = vmatprep.subr.bf16.mxu1 %v3145_v41 }
0x12bc   :  { %3019 = vmatpush3.bf16.msra.mxu1 %v3145_v41 }
0x12bd   :  { %3020 = vmatprep.subr.bf16.mxu1 %v3146_v60 }
0x12c0   :  { %3021 = vmatpush3.bf16.msra.mxu1 %v3146_v60 }
0x1338   :  { %v2373_v62 = vpop.xlane.xlu0 %2372 }
0x1339   :  { %v2383_v43 = vmul.f32 0.015625, %v2373_v62 }
0x133a   :  { %v2376_v26 = vpop.xlane.xlu1 %2375 }
0x133b   :  { %v2384_v50 = vmul.f32 0.015625, %v2376_v26  ;;  %v2407_v22 = vmul.f32 %v2383_v43, %v2383_v43  ;;  %v2415_v40 = vsub.f32 %v4279_v57, %v2383_v43 }
0x133c   :  { %v2393_v13 = vpop.xlane.xlu0 %2392 }
0x133d   :  { %v2403_v20 = vmul.f32 0.015625, %v2393_v13  ;;  %v2408_v36 = vmul.f32 %v2384_v50, %v2384_v50  ;;  %v2416_v52 = vsub.f32 %v4285_v4, %v2384_v50 }
0x133e   :  { %v2396_v39 = vpop.xlane.xlu1 %2395 }
0x133f   :  { %v2411_v55 = vsub.f32 %v2403_v20, %v2407_v22  ;;  %v2404_v31 = vmul.f32 0.015625, %v2396_v39 }
0x1340   :  { %v2379_v47 = vpop.xlane.xlu0 %2378 }
0x1341   :  { %v2419_v32 = vadd.f32 1e-05, %v2411_v55  ;;  %v2412_v18 = vsub.f32 %v2404_v31, %v2408_v36  ;;  %v2385_v56 = vmul.f32 0.015625, %v2379_v47 }
0x1342   :  { %v2382_v23 = vpop.xlane.xlu1 %2381 }
0x1343   :  { %3275 = vrsqrt.f32 %v2419_v32  ;;  %v2420_v1 = vadd.f32 1e-05, %v2412_v18  ;;  %v2386_v24 = vmul.f32 0.015625, %v2382_v23  ;;  %v2409_v45 = vmul.f32 %v2385_v56, %v2385_v56 }
0x1344   :  { %v2399_v51 = vpop.xlane.xlu0 %2398  ;;  %v2417_v61 = vsub.f32 %v4297_v11, %v2385_v56 }
0x1345   :  { %3277 = vrsqrt.f32 %v2420_v1  ;;  %v2405_v58 = vmul.f32 0.015625, %v2399_v51  ;;  %v2410_v25 = vmul.f32 %v2386_v24, %v2386_v24  ;;  %v2418_v19 = vsub.f32 %v4302_v16, %v2386_v24 }
0x1346   :  { %v2402_v59 = vpop.xlane.xlu1 %2401 }
0x1347   :  { %v2413_v29 = vsub.f32 %v2405_v58, %v2409_v45  ;;  %v2406_v28 = vmul.f32 0.015625, %v2402_v59 }
0x1349   :  { %v2421_v46 = vadd.f32 1e-05, %v2413_v29  ;;  %v2414_v42 = vsub.f32 %v2406_v28, %v2410_v25 }
0x134b   :  { %3279 = vrsqrt.f32 %v2421_v46  ;;  %v2422_v54 = vadd.f32 1e-05, %v2414_v42 }
0x134d   :  { %v3276_v48 = vpop.eup %3275  ;;  %3281 = vrsqrt.f32 %v2422_v54 }
0x134e   :  { %v2427_v30 = vmul.f32 %v3276_v48, %v2415_v40 }
0x134f   :  { %v3278_v33 = vpop.eup %3277 }
0x1350   :  { %v2428_v44 = vmul.f32 %v3278_v33, %v2416_v52  ;;  %v2437_v27 = vmul.f32 %v2728_v35, %v2427_v30 }
0x1352   :  { %v2438_v3 = vmul.f32 %v2728_v35, %v2428_v44 }
0x1354   :  { %v2449_v5 = vpack.c.bf16 %v2438_v3, %v2437_v27 }
0x1355   :  { %v3280_v63 = vpop.eup %3279 }
0x1356   :  { %v2429_v57 = vmul.f32 %v3280_v63, %v2417_v61  ;;  %3022 = vmatprep.mubr.msk.bf16.mxu1 %vm83_vm0, %v2449_v5 }
0x1357   :  { %v3282_v0 = vpop.eup %3281 }
0x1358   :  { %v2430_v4 = vmul.f32 %v3282_v0, %v2418_v19  ;;  %v2439_v7 = vmul.f32 %v2728_v35, %v2429_v57 }
0x135a   :  { %v2440_v17 = vmul.f32 %v2728_v35, %v2430_v4 }
0x135c   :  { %v2450_v6 = vpack.c.bf16 %v2440_v17, %v2439_v7 }
0x135e   :  { %3023 = vmatmul.mubr.msk.bf16.vlgmr.msra.gmra.mrb[40].mxu1 %vm83_vm0, %v2450_v6 }
0x1431   :  { %v3024_v2 = vpop.f32.mrb[40].mxu1 }
0x1432   :  { %v2531_v9 = vadd.f32 %v3024_v2, %v2729_v8  ;;  %v2522_v10 = vpop.f32.mrb[41].mxu1 }
0x1433   :  { %v2523_v11 = vadd.f32 %v2729_v8, %v2522_v10  ;;  %v3025_v12 = vpop.f32.mrb[42].mxu1 }
0x1434   :  { %2539 = vst [vmem:[#allocation2 + $0x10] sm:$0xff] %v2531_v9  ;;  %v2534_v14 = vadd.f32 %v3025_v12, %v2729_v8  ;;  %v2525_v16 = vpop.f32.mrb[43].mxu1 }
0x1435   :  { %2537 = vst [vmem:[#allocation2] sm:$0xff] %v2523_v11  ;;  %v2526_v15 = vadd.f32 %v2729_v8, %v2525_v16 }
0x1436   :  { %2540 = vst [vmem:[#allocation2 + $0x18] sm:$0xff] %v2534_v14 }
0x1437   :  { %2538 = vst [vmem:[#allocation2 + $0x8] sm:$0xff] %v2526_v15 }
0x1438   :  { %3310 = shalt.err (!%p3307_p4)
}
0x1439   :  { %s3311_s25 = scalar_lea.hbm %s4365_s17, 512 }
0x143a   :  { %p3312_p5 = scmp.ne.s32.totalorder %s4365_s17, %s3311_s25  ;;  %p3315_p6 = scmp.lt.u32.totalorder %s3311_s25, %s4365_s17 }
0x143c   :  { %p3317_p7 = pnand %p3315_p6, %p3312_p5 }
0x143e   :  { %3320 = shalt.err (!%p3317_p7)
}
0x143f   :  { %s3326_s27 = smov 128   ;;  %s3327_s8 = smov 8  }
0x1440   :  { %2552 = dma.vmem_to_hbm [thread:$0]  %s2547_s5, 512, %s4365_s17, [#allocation3], %s3326_s27, %s3326_s27, %s3327_s8  }
0x1441   :  { %3321 = dma.done.wait [#allocation3], 512  }
0x1442   :  { %3322 = vsyncadd [#allocation3], 4294966784 }
0x1443   :  { %2556 = vsyncpa [#allocation3], 1 }

</bundles_post_ra>
